<compile_context>
chip_gen: v7x
topology: tpu7x:2x2x1
jax: 0.10.0
libtpu: 0.0.40
codegen_flags: <defaults>
</compile_context>

<pallas_src>
import functools

import jax
import jax.numpy as jnp
from jax.experimental import pallas as pl
from jax.experimental.pallas import tpu as pltpu


def _round_up(x, m):
    return (x + m - 1) // m * m


def _largest_divisor_leq(n, cap):
    cap = max(1, min(n, cap))
    for d in range(cap, 0, -1):
        if n % d == 0:
            return d
    return 1


def _fused_heads_kernel(x_ref, w_ref, b_ref, o_ref, *, heads_per_block, c_pad,
                        apply_act):
    # x_ref: (TB, D)              -- batch tile of input features (weight dtype)
    # w_ref: (D, HPB*C_pad) bf16  -- this head-group's fused, lane-padded weights
    # b_ref: (1, HPB*C_pad) f32   -- fused bias (padded lanes = -1e30)
    # o_ref: (TB, HPB*C_pad) f32  -- lane-dense output slab
    logits = jnp.dot(x_ref[...], w_ref[...],
                     preferred_element_type=jnp.float32) + b_ref[...]
    if apply_act:
        # Per-head softmax over that head's (padded) class block.  Slices are
        # static and 128-lane aligned -> pure vreg-column selects.
        for k in range(heads_per_block):
            lo = k * c_pad
            blk = logits[:, lo:lo + c_pad]
            m = jnp.max(blk, axis=-1, keepdims=True)
            e = jnp.exp(blk - m)          # padded lanes: exp(-1e30 - m) == 0
            s = jnp.sum(e, axis=-1, keepdims=True)
            o_ref[:, lo:lo + c_pad] = (e * pl.reciprocal(s, approx=True)).astype(
                o_ref.dtype)
    else:
        o_ref[...] = logits.astype(o_ref.dtype)


def multi_head_decoder_clip(
    x,
    weights,
    biases,
    num_classes,
    *,
    apply_act=True,
    weight_dtype=jnp.bfloat16,
    batch_tile=512,
    weight_block_budget_bytes=8 << 20,
):
    """Pallas implementation of MultiHeadDecoder_clip.forward (eval path).

    Args:
      x:        (B, D) float32 input features (D = 2560 in the real module).
      weights:  (K, D, C_total) float32, one Linear weight (transposed) per head.
      biases:   (K, 1, C_total) float32.
      num_classes: list of ints summing to C_total (cfg.MODEL.NUM_CLASSES).
      apply_act: apply per-head softmax (HEAD_ACT="softmax", not TEST.NO_ACT).
      weight_dtype: dtype the fused weight slab (and x) is DMA'd in.
      batch_tile: max rows per grid step when B is large.
      weight_block_budget_bytes: per-step weight-block VMEM budget (bounds the
        number of heads fused per grid step).

    Returns: tuple of arrays, one per entry of num_classes, each (B, K, n_i).
    """
    B, D = x.shape
    K, Dw, C = weights.shape
    assert Dw == D and biases.shape == (K, 1, C)
    assert sum(num_classes) == C

    c_pad = _round_up(C, 128)       # lane-dense per-head class block
    n_out = K * c_pad

    # Fuse + pad the per-head weights into one (D, K*C_pad) slab (column index
    # = k*C_pad + c) and the biases into (1, K*C_pad).  Padded weight columns
    # are 0; padded bias lanes are -1e30 so they vanish under softmax.
    w_pad = jnp.pad(weights, ((0, 0), (0, 0), (0, c_pad - C)))
    w_fused = jnp.transpose(w_pad, (1, 0, 2)).reshape(D, n_out).astype(weight_dtype)
    pad_fill = -1e30 if apply_act else 0.0
    b_pad = jnp.pad(biases[:, 0, :], ((0, 0), (0, c_pad - C)),
                    constant_values=pad_fill)
    b_fused = b_pad.reshape(1, n_out).astype(jnp.float32)

    # Cast x once in the wrapper (halves activation DMA vs. in-kernel cast).
    x_in = x.astype(weight_dtype)

    # Batch tiling (pad B up to a tile multiple; padded rows sliced off later).
    if B <= batch_tile:
        tb, b_padded = B, B
    else:
        tb = batch_tile
        b_padded = _round_up(B, tb)
        if b_padded != B:
            x_in = jnp.pad(x_in, ((0, b_padded - B), (0, 0)))
    nb = b_padded // tb

    # Head tiling: bound the per-step weight block to the VMEM budget.
    itemsize = jnp.dtype(weight_dtype).itemsize
    per_head_w_bytes = D * c_pad * itemsize
    hpb = _largest_divisor_leq(K, weight_block_budget_bytes // per_head_w_bytes)
    nh = K // hpb
    blk_n = hpb * c_pad

    kernel = functools.partial(
        _fused_heads_kernel, heads_per_block=hpb, c_pad=c_pad, apply_act=apply_act)

    bytes_accessed = (
        nh * b_padded * D * itemsize                 # x (re-read per head group)
        + D * n_out * itemsize                       # fused weights (read once)
        + n_out * 4                                  # bias
        + b_padded * n_out * 4                       # output
    )
    cost = pl.CostEstimate(
        flops=2 * b_padded * D * n_out,
        transcendentals=b_padded * n_out if apply_act else 0,
        bytes_accessed=bytes_accessed,
    )

    out = pl.pallas_call(
        kernel,
        out_shape=jax.ShapeDtypeStruct((b_padded, n_out), jnp.float32),
        grid_spec=pltpu.PrefetchScalarGridSpec(
            num_scalar_prefetch=0,
            # Batch innermost: the (large) weight block index is constant over
            # inner steps, so it is DMA'd only once per head group.
            grid=(nh, nb),
            in_specs=[
                pl.BlockSpec((tb, D), lambda h, i: (i, 0)),       # x batch tile
                pl.BlockSpec((D, blk_n), lambda h, i: (0, h)),    # fused W block
                pl.BlockSpec((1, blk_n), lambda h, i: (0, h)),    # fused b block
            ],
            out_specs=pl.BlockSpec((tb, blk_n), lambda h, i: (i, h)),
        ),
        compiler_params=pltpu.CompilerParams(
            dimension_semantics=("parallel", "parallel"),  # independent tiles
        ),
        cost_estimate=cost,
    )(x_in, w_fused, b_fused)

    # (B, K*C_pad) -> (B, K, C_pad) is a free contiguous reshape; drop batch
    # and lane padding, then torch.split(x, NUM_CLASSES, dim=-1).
    out_bkc = out[:B].reshape(B, K, c_pad)[:, :, :C]
    splits = []
    off = 0
    for n in num_classes:
        splits.append(out_bkc[:, :, off:off + n])
        off += n
    return tuple(splits)


def init_params(key, num_heads, dim_in, c_total):
    """Deterministic xavier-uniform-like init for the per-head Linear layers."""
    kw, kb = jax.random.split(key)
    bound = (6.0 / (dim_in + c_total)) ** 0.5
    weights = jax.random.uniform(
        kw, (num_heads, dim_in, c_total), jnp.float32, -bound, bound)
    biases = jax.random.uniform(
        kb, (num_heads, 1, c_total), jnp.float32, -0.01, 0.01)
    return weights, biases


if __name__ == "__main__":
    # Synthetic cfg (small but consistent with the module):
    #   cfg.MODEL.NUM_CLASSES = [16, 32]          (verb / noun)
    #   cfg.FORECASTING.NUM_ACTIONS_TO_PREDICT = 2
    #   head_dim_in = 2560  (hard-coded in the module)
    #   cfg.MODEL.DROPOUT_RATE = 0.0, HEAD_ACT = "softmax", TEST.NO_ACT = False
    NUM_CLASSES = [16, 32]
    K = 2
    D = 2560
    B = 2
    C_TOTAL = sum(NUM_CLASSES)

    key = jax.random.PRNGKey(0)
    kx, kp = jax.random.split(key)
    x = jax.random.normal(kx, (B, D), jnp.float32)
    weights, biases = init_params(kp, K, D, C_TOTAL)

    outs = multi_head_decoder_clip(x, weights, biases, NUM_CLASSES, apply_act=True)
    outs = jax.block_until_ready(outs)

    # Pure-JAX reference of the same math (bf16 inputs/weights, f32 accumulate).
    # NOTE: like the PyTorch module, each head's softmax is over the
    # concatenated (verb+noun) class dim; the split happens afterwards.
    logits = (
        jnp.einsum(
            "bd,kdc->bkc",
            x.astype(jnp.bfloat16),
            weights.astype(jnp.bfloat16),
            preferred_element_type=jnp.float32,
        )
        + biases[:, 0, :][None]
    )
    probs = jax.nn.softmax(logits, axis=-1)
    ref = (probs[:, :, : NUM_CLASSES[0]], probs[:, :, NUM_CLASSES[0]:])
    for o, r, n in zip(outs, ref, NUM_CLASSES):
        assert o.shape == (B, K, n), o.shape
        assert jnp.allclose(o, r, atol=2e-3), "mismatch vs reference"

    print("KERNEL_OK")
</pallas_src>

<mosaic_0001>
module attributes {stable_mosaic.version = 11 : i64} {
  func.func @_fused_heads_kernel(%arg0: i32, %arg1: i32, %arg2: memref<2x2560xbf16, #tpu.memory_space<vmem>>, %arg3: memref<2560x256xbf16, #tpu.memory_space<vmem>>, %arg4: memref<1x256xf32, #tpu.memory_space<vmem>>, %arg5: memref<2x256xf32, #tpu.memory_space<vmem>>) attributes {dimension_semantics = [#tpu.dimension_semantics<parallel>, #tpu.dimension_semantics<parallel>], iteration_bounds = array<i64: 1, 1>, scalar_prefetch = 0 : i64, scratch_operands = 0 : i64, tpu.core_type = #tpu.core_type<tc>, window_params = [{transform_indices = @transform_0, window_bounds = array<i64: 2, 2560>}, {transform_indices = @transform_1, window_bounds = array<i64: 2560, 256>}, {transform_indices = @transform_2, window_bounds = array<i64: 1, 256>}, {transform_indices = @transform_3, window_bounds = array<i64: 2, 256>}]} {
    %c0 = arith.constant 0 : index
    %c0_0 = arith.constant 0 : index
    %0 = vector.load %arg2[%c0, %c0_0] : memref<2x2560xbf16, #tpu.memory_space<vmem>>, vector<2x2560xbf16>
    %c0_1 = arith.constant 0 : index
    %c0_2 = arith.constant 0 : index
    %1 = vector.load %arg3[%c0_1, %c0_2] : memref<2560x256xbf16, #tpu.memory_space<vmem>>, vector<2560x256xbf16>
    %cst = arith.constant dense<0.000000e+00> : vector<2x256xf32>
    %2 = tpu.matmul %0, %1, %cst {dimension_numbers = #tpu.dot_dimension_numbers<[1], [0], [0], [1], [0, 0, 1, 1], [], []>} : vector<2x2560xbf16>, vector<2560x256xbf16>, vector<2x256xf32> -> vector<2x256xf32>
    %c0_3 = arith.constant 0 : index
    %c0_4 = arith.constant 0 : index
    %3 = vector.load %arg4[%c0_3, %c0_4] : memref<1x256xf32, #tpu.memory_space<vmem>>, vector<1x256xf32>
    %4 = vector.broadcast %3 : vector<1x256xf32> to vector<2x256xf32>
    %5 = arith.addf %2, %4 : vector<2x256xf32>
    %6 = vector.extract_strided_slice %5 {offsets = [0, 0], sizes = [2, 128], strides = [1, 1]} : vector<2x256xf32> to vector<2x128xf32>
    %cst_5 = arith.constant dense<0xFF800000> : vector<2xf32>
    %7 = vector.multi_reduction <maximumf>, %6, %cst_5 [1] : vector<2x128xf32> to vector<2xf32>
    %8 = vector.shape_cast %7 : vector<2xf32> to vector<2x1xf32>
    %9 = vector.broadcast %8 : vector<2x1xf32> to vector<2x128xf32>
    %10 = arith.subf %6, %9 : vector<2x128xf32>
    %11 = math.exp %10 : vector<2x128xf32>
    %cst_6 = arith.constant dense<0.000000e+00> : vector<2xf32>
    %12 = vector.multi_reduction <add>, %11, %cst_6 [1] : vector<2x128xf32> to vector<2xf32>
    %13 = vector.shape_cast %12 : vector<2xf32> to vector<2x1xf32>
    %14 = tpu.reciprocal %13 {approx = true} : vector<2x1xf32> -> vector<2x1xf32>
    %15 = vector.broadcast %14 : vector<2x1xf32> to vector<2x128xf32>
    %16 = arith.mulf %11, %15 : vector<2x128xf32>
    %c0_7 = arith.constant 0 : index
    %c0_8 = arith.constant 0 : index
    %17 = vector.load %arg5[%c0_7, %c0_8] : memref<2x256xf32, #tpu.memory_space<vmem>>, vector<2x128xf32>
    tpu.vector_store %arg5[%c0_7, %c0_8], %16 {strides = array<i32>} : memref<2x256xf32, #tpu.memory_space<vmem>>, vector<2x128xf32>,
    %18 = vector.extract_strided_slice %5 {offsets = [0, 128], sizes = [2, 128], strides = [1, 1]} : vector<2x256xf32> to vector<2x128xf32>
    %cst_9 = arith.constant dense<0xFF800000> : vector<2xf32>
    %19 = vector.multi_reduction <maximumf>, %18, %cst_9 [1] : vector<2x128xf32> to vector<2xf32>
    %20 = vector.shape_cast %19 : vector<2xf32> to vector<2x1xf32>
    %21 = vector.broadcast %20 : vector<2x1xf32> to vector<2x128xf32>
    %22 = arith.subf %18, %21 : vector<2x128xf32>
    %23 = math.exp %22 : vector<2x128xf32>
    %cst_10 = arith.constant dense<0.000000e+00> : vector<2xf32>
    %24 = vector.multi_reduction <add>, %23, %cst_10 [1] : vector<2x128xf32> to vector<2xf32>
    %25 = vector.shape_cast %24 : vector<2xf32> to vector<2x1xf32>
    %26 = tpu.reciprocal %25 {approx = true} : vector<2x1xf32> -> vector<2x1xf32>
    %27 = vector.broadcast %26 : vector<2x1xf32> to vector<2x128xf32>
    %28 = arith.mulf %23, %27 : vector<2x128xf32>
    %c0_11 = arith.constant 0 : index
    %c128 = arith.constant 128 : index
    %29 = vector.load %arg5[%c0_11, %c128] : memref<2x256xf32, #tpu.memory_space<vmem>>, vector<2x128xf32>
    tpu.vector_store %arg5[%c0_11, %c128], %28 {strides = array<i32>} : memref<2x256xf32, #tpu.memory_space<vmem>>, vector<2x128xf32>,
    return
  }
  func.func @transform_0(%arg0: i32, %arg1: i32) -> (i32, i32) {
    %c0_i32 = arith.constant 0 : i32
    %c0_i32_0 = arith.constant 0 : i32
    return %arg1, %c0_i32 : i32, i32
  }
  func.func @transform_1(%arg0: i32, %arg1: i32) -> (i32, i32) {
    %c0_i32 = arith.constant 0 : i32
    %c0_i32_0 = arith.constant 0 : i32
    return %c0_i32, %arg0 : i32, i32
  }
  func.func @transform_2(%arg0: i32, %arg1: i32) -> (i32, i32) {
    %c0_i32 = arith.constant 0 : i32
    %c0_i32_0 = arith.constant 0 : i32
    return %c0_i32, %arg0 : i32, i32
  }
  func.func @transform_3(%arg0: i32, %arg1: i32) -> (i32, i32) {
    %c0_i32 = arith.constant 0 : i32
    return %arg1, %arg0 : i32, i32
  }
}

</mosaic_0001>

<bundles_post_ra>
// kernel: tpu_custom_call.1
= control target key start
LH: loop header
LB: loop body
LE: loop exit
PB: predicated region body
PF: predicated region fallthrough
CT: control target
= control target key end

     0   :  { %8 = vsyncpa [#allocation3], 0  ;;  %s3701_s0 = inlined_call_operand.hbm [shape: bf16[2,2560], index: 0, kind: input, shape index: {}]   ;;  %s3702_s1 = inlined_call_operand.hbm [shape: bf16[2560,256], index: 1, kind: input, shape index: {}]   ;;  %s3703_s2 = inlined_call_operand.hbm [shape: f32[1,256], index: 2, kind: input, shape index: {}]   ;;  %s3704_s3 = inlined_call_operand.hbm [shape: f32[2,256], index: 3, kind: output, shape index: {}]  }
   0x1   :  { %9 = vsyncpa [#allocation6], 0 }
   0x2   :  { %10 = vsyncpa [#allocation4], 0  ;;  %s3531_s12 = smov [#allocation5]   ;;  %s3437_s16 = scalar_lea.hbm %s3702_s1, 40960 }
   0x3   :  { %s26_s13 = sshll.u32 %s3531_s12, 4  ;;  %p3438_p0 = scmp.ne.s32.totalorder %s3702_s1, %s3437_s16  ;;  %s27_s13 = int_to_ptr.vmem [resolvable:$true] %s26_s13 }
   0x4   :  { %p3441_p1 = scmp.lt.u32.totalorder %s3437_s16, %s3702_s1 }
   0x6   :  { %p3443_p2 = pnand %p3441_p1, %p3438_p0 }
   0x8   :  { %3446 = shalt.err (!%p3443_p2)
}
   0x9   :  { %s3447_s21 = scalar_lea.vmem %s27_s13, 40960  ;;  %p3452_p4 = scmp.lt.s32.totalorder %s27_s13, %s27_s13 }
   0xa   :  { %p3448_p3 = scmp.ne.s32.totalorder %s27_s13, %s3447_s21  ;;  %p3453_p5 = scmp.lt.s32.totalorder %s3447_s21, %s3447_s21 }
   0xc   :  { %p3454_p6 = por %p3453_p5, %p3452_p4 }
   0xe   :  { %p3455_p7 = pnand %p3454_p6, %p3448_p3 }
  0x10   :  { %3458 = shalt.err (!%p3455_p7)
}
  0x11   :  { %s3532_s22 = smov 128   ;;  %s3533_s23 = smov 8  }
  0x12   :  { %32 = dma.hbm_to_vmem [thread:$0]  %s3702_s1, 40960, %s27_s13, [#allocation6], %s3532_s22, %s3532_s22, %s3533_s23  }
  0x13   :  { %s3534_s26 = smov [#allocation2]   ;;  %s3535_s28 = smov [#allocation7]  }
  0x14   :  { %s17_s27 = sshll.u32 %s3534_s26, 4  ;;  %s39_s29 = sshll.u32 %s3535_s28, 4  ;;  %s18_s27 = int_to_ptr.vmem [resolvable:$true] %s17_s27  ;;  %s40_s29 = int_to_ptr.vmem [resolvable:$true] %s39_s29 }
  0x15   :  { %s3459_s5 = scalar_lea.hbm %s3701_s0, 320 }
  0x16   :  { %p3460_p8 = scmp.ne.s32.totalorder %s3701_s0, %s3459_s5  ;;  %p3463_p9 = scmp.lt.u32.totalorder %s3459_s5, %s3701_s0 }
  0x18   :  { %p3465_p10 = pnand %p3463_p9, %p3460_p8 }
  0x1a   :  { %3468 = shalt.err (!%p3465_p10)
}
  0x1b   :  { %s3469_s1 = scalar_lea.vmem %s18_s27, 320  ;;  %p3474_p12 = scmp.lt.s32.totalorder %s18_s27, %s18_s27 }
  0x1c   :  { %p3470_p11 = scmp.ne.s32.totalorder %s18_s27, %s3469_s1  ;;  %p3475_p13 = scmp.lt.s32.totalorder %s3469_s1, %s3469_s1 }
  0x1e   :  { %p3476_p0 = por %p3475_p13, %p3474_p12 }
  0x20   :  { %p3477_p1 = pnand %p3476_p0, %p3470_p11 }
  0x22   :  { %3480 = shalt.err (!%p3477_p1)
}
  0x23   :  { %20 = dma.hbm_to_vmem [thread:$0]  %s3701_s0, 320, %s18_s27, [#allocation3]  }
  0x24   :  { %s3481_s14 = scalar_lea.hbm %s3703_s2, 32 }
  0x25   :  { %p3482_p2 = scmp.ne.s32.totalorder %s3703_s2, %s3481_s14  ;;  %p3485_p3 = scmp.lt.u32.totalorder %s3481_s14, %s3703_s2 }
  0x27   :  { %p3487_p4 = pnand %p3485_p3, %p3482_p2 }
  0x29   :  { %3490 = shalt.err (!%p3487_p4)
}
  0x2a   :  { %s3491_s19 = scalar_lea.vmem %s40_s29, 32  ;;  %p3496_p6 = scmp.lt.s32.totalorder %s40_s29, %s40_s29 }
  0x2b   :  { %p3492_p5 = scmp.ne.s32.totalorder %s40_s29, %s3491_s19  ;;  %p3497_p7 = scmp.lt.s32.totalorder %s3491_s19, %s3491_s19 }
  0x2d   :  { %p3498_p8 = por %p3497_p7, %p3496_p6 }
  0x2f   :  { %p3499_p9 = pnand %p3498_p8, %p3492_p5 }
  0x31   :  { %3502 = shalt.err (!%p3499_p9)
}
  0x32   :  { %42 = dma.hbm_to_vmem [thread:$0]  %s3703_s2, 32, %s40_s29, [#allocation6]  }
  0x33   :  { %3525 = dma.done.wait [#allocation3], 320  }
  0x34   :  { %3526 = vsyncadd [#allocation3], 4294966976 }
  0x35   :  { %3527 = dma.done.wait [#allocation6], 40992  }
  0x36   :  { %3528 = vsyncadd [#allocation6], 4294926304  ;;  %v2947_v0 = vld [vmem:[#allocation5 + $0x4] ss:$8 sps:$4 sm:$0xff]   ;;  %v2951_v2 = vld [vmem:[#allocation5] ss:$8 sps:$4 sm:$0xff]   ;;  %v377_v38 = vlaneseq }
  0x37   :  { %v2949_v1 = vld [vmem:[#allocation5 + $0x504] ss:$8 sps:$4 sm:$0xff]   ;;  %2132 = vmatprep.subr.bf16.mxu1 %v2947_v0  ;;  %v2952_v3 = vld [vmem:[#allocation5 + $0x500] ss:$8 sps:$4 sm:$0xff]   ;;  %v2953_v4 = vld [vmem:[#allocation5 + $0x14] ss:$8 sps:$4 sm:$0xff]  }
  0x38   :  { %2337 = vmatprep.subr.bf16.mxu0 %v2949_v1  ;;  %2133 = vmatpush1.bf16.msra.mxu1 %v2951_v2  ;;  %v2955_v5 = vld [vmem:[#allocation5 + $0x514] ss:$8 sps:$4 sm:$0xff]   ;;  %v2957_v6 = vld [vmem:[#allocation5 + $0x10] ss:$8 sps:$4 sm:$0xff]   ;;  %v2959_v8 = vld [vmem:[#allocation5 + $0x24] ss:$8 sps:$4 sm:$0xff]  }
  0x39   :  { %2338 = vmatpush1.bf16.msra.mxu0 %v2952_v3  ;;  %2134 = vmatprep.subr.bf16.mxu1 %v2953_v4  ;;  %v2958_v7 = vld [vmem:[#allocation5 + $0x510] ss:$8 sps:$4 sm:$0xff]   ;;  %v2961_v9 = vld [vmem:[#allocation5 + $0x524] ss:$8 sps:$4 sm:$0xff]   ;;  %v2963_v10 = vld [vmem:[#allocation5 + $0x20] ss:$8 sps:$4 sm:$0xff]  }
  0x3a   :  { %2339 = vmatprep.subr.bf16.mxu0 %v2955_v5  ;;  %v2964_v11 = vld [vmem:[#allocation5 + $0x520] ss:$8 sps:$4 sm:$0xff]   ;;  %v2965_v12 = vld [vmem:[#allocation5 + $0x34] ss:$8 sps:$4 sm:$0xff]   ;;  %v2969_v14 = vld [vmem:[#allocation5 + $0x30] ss:$8 sps:$4 sm:$0xff]  }
  0x3b   :  { %v2967_v13 = vld [vmem:[#allocation5 + $0x534] ss:$8 sps:$4 sm:$0xff]   ;;  %v2970_v15 = vld [vmem:[#allocation5 + $0x530] ss:$8 sps:$4 sm:$0xff]   ;;  %v2971_v16 = vld [vmem:[#allocation5 + $0x44] ss:$8 sps:$4 sm:$0xff]  }
  0x3c   :  { %2135 = vmatpush1.bf16.msra.mxu1 %v2957_v6  ;;  %v2973_v17 = vld [vmem:[#allocation5 + $0x544] ss:$8 sps:$4 sm:$0xff]   ;;  %v2975_v18 = vld [vmem:[#allocation5 + $0x40] ss:$8 sps:$4 sm:$0xff]   ;;  %v2977_v20 = vld [vmem:[#allocation5 + $0x54] ss:$8 sps:$4 sm:$0xff]  }
  0x3d   :  { %2340 = vmatpush1.bf16.msra.mxu0 %v2958_v7  ;;  %2136 = vmatprep.subr.bf16.mxu1 %v2959_v8  ;;  %v2976_v19 = vld [vmem:[#allocation5 + $0x540] ss:$8 sps:$4 sm:$0xff]   ;;  %v2979_v21 = vld [vmem:[#allocation5 + $0x554] ss:$8 sps:$4 sm:$0xff]   ;;  %v2981_v22 = vld [vmem:[#allocation5 + $0x50] ss:$8 sps:$4 sm:$0xff]  }
  0x3e   :  { %2341 = vmatprep.subr.bf16.mxu0 %v2961_v9  ;;  %v2982_v23 = vld [vmem:[#allocation5 + $0x550] ss:$8 sps:$4 sm:$0xff]   ;;  %v2983_v24 = vld [vmem:[#allocation5 + $0x64] ss:$8 sps:$4 sm:$0xff]   ;;  %v2987_v26 = vld [vmem:[#allocation5 + $0x60] ss:$8 sps:$4 sm:$0xff]  }
  0x3f   :  { %v2985_v25 = vld [vmem:[#allocation5 + $0x564] ss:$8 sps:$4 sm:$0xff]   ;;  %v2988_v27 = vld [vmem:[#allocation5 + $0x560] ss:$8 sps:$4 sm:$0xff]   ;;  %v2989_v28 = vld [vmem:[#allocation5 + $0x74] ss:$8 sps:$4 sm:$0xff]  }
  0x40   :  { %2137 = vmatpush1.bf16.msra.mxu1 %v2963_v10  ;;  %v2991_v29 = vld [vmem:[#allocation5 + $0x574] ss:$8 sps:$4 sm:$0xff]   ;;  %v2993_v30 = vld [vmem:[#allocation5 + $0x70] ss:$8 sps:$4 sm:$0xff]   ;;  %v2995_v32 = vld [vmem:[#allocation5 + $0x84] ss:$8 sps:$4 sm:$0xff]  }
  0x41   :  { %2342 = vmatpush1.bf16.msra.mxu0 %v2964_v11  ;;  %2138 = vmatprep.subr.bf16.mxu1 %v2965_v12  ;;  %v2994_v31 = vld [vmem:[#allocation5 + $0x570] ss:$8 sps:$4 sm:$0xff]   ;;  %v2997_v33 = vld [vmem:[#allocation5 + $0x584] ss:$8 sps:$4 sm:$0xff]   ;;  %v2999_v34 = vld [vmem:[#allocation5 + $0x80] ss:$8 sps:$4 sm:$0xff]  }
  0x42   :  { %2343 = vmatprep.subr.bf16.mxu0 %v2967_v13  ;;  %v3000_v35 = vld [vmem:[#allocation5 + $0x580] ss:$8 sps:$4 sm:$0xff]   ;;  %v3001_v36 = vld [vmem:[#allocation5 + $0x94] ss:$8 sps:$4 sm:$0xff]   ;;  %v3536_v39 = vmov 1966171168  }
  0x43   :  { %v3003_v37 = vld [vmem:[#allocation5 + $0x594] ss:$8 sps:$4 sm:$0xff]   ;;  %v392_v40 = vunpack.c.l.s4 %v3536_v39  ;;  %v3005_v41 = vld [vmem:[#allocation5 + $0x90] ss:$8 sps:$4 sm:$0xff]   ;;  %v3007_v43 = vld [vmem:[#allocation5 + $0xa4] ss:$8 sps:$4 sm:$0xff]  }
  0x44   :  { %2139 = vmatpush1.bf16.msra.mxu1 %v2969_v14  ;;  %v3006_v42 = vld [vmem:[#allocation5 + $0x590] ss:$8 sps:$4 sm:$0xff]   ;;  %v3009_v44 = vld [vmem:[#allocation5 + $0x5a4] ss:$8 sps:$4 sm:$0xff]   ;;  %v3594_v45 = vshrl.u32 %v377_v38, 7  ;;  %vm2542_vm0 = vcmask 1041408  }
  0x45   :  { %2344 = vmatpush1.bf16.msra.mxu0 %v2970_v15  ;;  %2140 = vmatprep.subr.bf16.mxu1 %v2971_v16  ;;  %v393_v46 = vunpack.c.0.s8 %v392_v40  ;;  %v3011_v47 = vld [vmem:[#allocation5 + $0xa0] ss:$8 sps:$4 sm:$0xff]   ;;  %v3013_v49 = vld [vmem:[#allocation5 + $0xb4] ss:$8 sps:$4 sm:$0xff]   ;;  %v3599_v52 = vld [vmem:[#allocation2] sm:$0xff]  ;;  %s3537_s2 = smov [#allocation8]  }
  0x46   :  { %2345 = vmatprep.subr.bf16.mxu0 %v2973_v17  ;;  %v3012_v48 = vld [vmem:[#allocation5 + $0x5a0] ss:$8 sps:$4 sm:$0xff]   ;;  %v3015_v50 = vld [vmem:[#allocation5 + $0x5b4] ss:$8 sps:$4 sm:$0xff]   ;;  %v3017_v53 = vld [vmem:[#allocation5 + $0xb0] ss:$8 sps:$4 sm:$0xff]  }
  0x47   :  { %v3597_v51 = vsub.s32 %v393_v46, %v3594_v45  ;;  %v3018_v55 = vld [vmem:[#allocation5 + $0x5b0] ss:$8 sps:$4 sm:$0xff]   ;;  %v3019_v57 = vld [vmem:[#allocation5 + $0xc4] ss:$8 sps:$4 sm:$0xff]   ;;  %v3023_v63 = vld [vmem:[#allocation5 + $0xc0] ss:$8 sps:$4 sm:$0xff]  }
  0x48   :  { %2141 = vmatpush1.bf16.msra.mxu1 %v2975_v18  ;;  %v53_v56 = vld [vmem:[#allocation2 + $0x8] sm:$0xff]  ;;  %v3021_v58 = vld [vmem:[#allocation5 + $0x5c4] ss:$8 sps:$4 sm:$0xff]   ;;  %v3024_v0 = vld [vmem:[#allocation5 + $0x5c0] ss:$8 sps:$4 sm:$0xff]   ;;  %s2573_s21 = sshll.u32 %s3537_s2, 4  ;;  %s2574_s21 = int_to_ptr.vmem [resolvable:$true] %s2573_s21 }
  0x49   :  { %2346 = vmatpush1.bf16.msra.mxu0 %v2976_v19  ;;  %2142 = vmatprep.subr.bf16.mxu1 %v2977_v20  ;;  %v397_v54 = vrot.slane %v3599_v52, %v3597_v51  ;;  %v446_v60 = vrot.slane %v53_v56, %v3597_v51  ;;  %v3025_v1 = vld [vmem:[#allocation5 + $0xd4] ss:$8 sps:$4 sm:$0xff]   ;;  %v3029_v5 = vld [vmem:[#allocation5 + $0xd0] ss:$8 sps:$4 sm:$0xff]   ;;  %v3031_v7 = vld [vmem:[#allocation5 + $0xe4] ss:$8 sps:$4 sm:$0xff]   ;;  %v439_v9 = vcombine.high %v53_v56, %v53_v56  ;;  %p3508_p11 = scmp.lt.s32.totalorder %s2574_s21, %s2574_s21 }
  0x4a   :  { %2347 = vmatprep.subr.bf16.mxu0 %v2979_v21  ;;  %v3027_v2 = vld [vmem:[#allocation5 + $0x5d4] ss:$8 sps:$4 sm:$0xff]   ;;  %v3030_v6 = vld [vmem:[#allocation5 + $0x5d0] ss:$8 sps:$4 sm:$0xff]   ;;  %v3033_v8 = vld [vmem:[#allocation5 + $0x5e4] ss:$8 sps:$4 sm:$0xff]  }
  0x4b   :  { %v405_v59 = vcombine.high %v397_v54, %v397_v54  ;;  %v454_v62 = vcombine.high %v446_v60, %v446_v60  ;;  %v3035_v10 = vld [vmem:[#allocation5 + $0xe0] ss:$8 sps:$4 sm:$0xff]   ;;  %v3037_v12 = vld [vmem:[#allocation5 + $0xf4] ss:$8 sps:$4 sm:$0xff]   ;;  %v3614_v14 = vrot.slane %v439_v9, %v3597_v51  ;;  %v3617_v15 = vrot.slane %v446_v60, %v3597_v51  ;;  %v3041_v16 = vld [vmem:[#allocation5 + $0xf0] ss:$8 sps:$4 sm:$0xff]  }
  0x4c   :  { %2143 = vmatpush1.bf16.msra.mxu1 %v2981_v22  ;;  %v3036_v11 = vld [vmem:[#allocation5 + $0x5e0] ss:$8 sps:$4 sm:$0xff]   ;;  %v3039_v13 = vld [vmem:[#allocation5 + $0x5f4] ss:$8 sps:$4 sm:$0xff]   ;;  %v3042_v17 = vld [vmem:[#allocation5 + $0x5f0] ss:$8 sps:$4 sm:$0xff]   ;;  %v3622_v21 = vrot.slane %v397_v54, %v3597_v51 }
  0x4d   :  { %2348 = vmatpush1.bf16.msra.mxu0 %v2982_v23  ;;  %2144 = vmatprep.subr.bf16.mxu1 %v2983_v24  ;;  %v3605_v61 = vrot.slane %v405_v59, %v3597_v51  ;;  %v3608_v3 = vrot.slane %v454_v62, %v3597_v51  ;;  %v3046_v18 = vld [vmem:[#allocation5 + $0x104] ss:$8 sps:$4 sm:$0xff]   ;;  %v455_v20 = vcombine.high %v3614_v14, %v3614_v14  ;;  %v3044_v23 = vld [vmem:[#allocation5 + $0x100] ss:$8 sps:$4 sm:$0xff]   ;;  %v3066_v38 = vld [vmem:[#allocation5 + $0x630] ss:$8 sps:$4 sm:$0xff]  }
  0x4e   :  { %2349 = vmatprep.subr.bf16.mxu0 %v2985_v25  ;;  %v3050_v19 = vld [vmem:[#allocation5 + $0x604] ss:$8 sps:$4 sm:$0xff]   ;;  %v484_v22 = vcombine.high %v3617_v15, %v3617_v15  ;;  %v3048_v24 = vld [vmem:[#allocation5 + $0x600] ss:$8 sps:$4 sm:$0xff]   ;;  %v3053_v25 = vld [vmem:[#allocation5 + $0x114] ss:$8 sps:$4 sm:$0xff]  }
  0x4f   :  { %2164 = vmatprep.mubr.bf16.mxu1 %v3605_v61  ;;  %v486_v4 = vcombine.high %v3608_v3, %v3608_v3  ;;  %v3071_v39 = vld [vmem:[#allocation5 + $0x144] ss:$8 sps:$4 sm:$0xff]   ;;  %v3075_v46 = vld [vmem:[#allocation5 + $0x150] ss:$8 sps:$4 sm:$0xff]   ;;  %v3089_v54 = vld [vmem:[#allocation5 + $0x174] ss:$8 sps:$4 sm:$0xff]  }
  0x50   :  { %2145 = vmatpush1.bf16.msra.mxu1 %v2987_v26  ;;  %v3056_v26 = vld [vmem:[#allocation5 + $0x614] ss:$8 sps:$4 sm:$0xff]   ;;  %v3074_v40 = vld [vmem:[#allocation5 + $0x644] ss:$8 sps:$4 sm:$0xff]   ;;  %v3087_v56 = vld [vmem:[#allocation5 + $0x170] ss:$8 sps:$4 sm:$0xff]  }
  0x51   :  { %2350 = vmatpush1.bf16.msra.mxu0 %v2988_v27  ;;  %2146 = vmatprep.subr.bf16.mxu1 %v2989_v28  ;;  %v437_v27 = vcombine.high %v3605_v61, %v3605_v61  ;;  %v3629_v28 = vrot.slane %v455_v20, %v3597_v51  ;;  %v3098_v59 = vld [vmem:[#allocation5 + $0x684] ss:$8 sps:$4 sm:$0xff]   ;;  %v3093_v60 = vld [vmem:[#allocation5 + $0x180] ss:$8 sps:$4 sm:$0xff]   ;;  %v3101_v62 = vld [vmem:[#allocation5 + $0x194] ss:$8 sps:$4 sm:$0xff]  }
  0x52   :  { %2351 = vmatprep.subr.bf16.mxu0 %v2991_v29  ;;  %2369 = vmatprep.mubr.bf16.mxu0 %v486_v4  ;;  %v3051_v29 = vld [vmem:[#allocation5 + $0x110] ss:$8 sps:$4 sm:$0xff]   ;;  %v3096_v61 = vld [vmem:[#allocation5 + $0x680] ss:$8 sps:$4 sm:$0xff]   ;;  %v3110_v4 = vld [vmem:[#allocation5 + $0x6a4] ss:$8 sps:$4 sm:$0xff]  }
  0x53   :  { %v3111_v9 = vld [vmem:[#allocation5 + $0x1b0] ss:$8 sps:$4 sm:$0xff]   ;;  %s3503_s22 = scalar_lea.vmem %s2574_s21, 64 }
  0x54   :  { %2147 = vmatpush1.bf16.msra.mxu1 %v2993_v30  ;;  %v3054_v30 = vld [vmem:[#allocation5 + $0x610] ss:$8 sps:$4 sm:$0xff]   ;;  %p3504_p10 = scmp.ne.s32.totalorder %s2574_s21, %s3503_s22  ;;  %p3509_p12 = scmp.lt.s32.totalorder %s3503_s22, %s3503_s22 }
  0x55   :  { %2352 = vmatpush1.bf16.msra.mxu0 %v2994_v31  ;;  %2148 = vmatprep.subr.bf16.mxu1 %v2995_v32  ;;  %v3059_v31 = vld [vmem:[#allocation5 + $0x124] ss:$8 sps:$4 sm:$0xff]   ;;  %v3126_v20 = vld [vmem:[#allocation5 + $0x6d0] ss:$8 sps:$4 sm:$0xff]  }
  0x56   :  { %2353 = vmatprep.subr.bf16.mxu0 %v2997_v33  ;;  %v3062_v32 = vld [vmem:[#allocation5 + $0x624] ss:$8 sps:$4 sm:$0xff]   ;;  %v3057_v33 = vld [vmem:[#allocation5 + $0x120] ss:$8 sps:$4 sm:$0xff]   ;;  %p3510_p13 = por %p3509_p12, %p3508_p11 }
  0x58   :  { %2149 = vmatpush1.bf16.msra.mxu1 %v2999_v34  ;;  %v3060_v34 = vld [vmem:[#allocation5 + $0x620] ss:$8 sps:$4 sm:$0xff]   ;;  %p3511_p0 = pnand %p3510_p13, %p3504_p10 }
  0x59   :  { %2354 = vmatpush1.bf16.msra.mxu0 %v3000_v35  ;;  %2150 = vmatprep.subr.bf16.mxu1 %v3001_v36  ;;  %v3065_v35 = vld [vmem:[#allocation5 + $0x134] ss:$8 sps:$4 sm:$0xff]  }
  0x5a   :  { %2355 = vmatprep.subr.bf16.mxu0 %v3003_v37  ;;  %v3068_v36 = vld [vmem:[#allocation5 + $0x634] ss:$8 sps:$4 sm:$0xff]   ;;  %v3063_v37 = vld [vmem:[#allocation5 + $0x130] ss:$8 sps:$4 sm:$0xff]  }
  0x5c   :  { %2151 = vmatpush1.bf16.msra.mxu1 %v3005_v41  ;;  %v3069_v41 = vld [vmem:[#allocation5 + $0x140] ss:$8 sps:$4 sm:$0xff]  }
  0x5d   :  { %2356 = vmatpush1.bf16.msra.mxu0 %v3006_v42  ;;  %2152 = vmatprep.subr.bf16.mxu1 %v3007_v43  ;;  %v3072_v42 = vld [vmem:[#allocation5 + $0x640] ss:$8 sps:$4 sm:$0xff]   ;;  %v3077_v43 = vld [vmem:[#allocation5 + $0x154] ss:$8 sps:$4 sm:$0xff]  }
  0x5e   :  { %2357 = vmatprep.subr.bf16.mxu0 %v3009_v44  ;;  %v3080_v44 = vld [vmem:[#allocation5 + $0x654] ss:$8 sps:$4 sm:$0xff]  }
  0x60   :  { %2153 = vmatpush1.bf16.msra.mxu1 %v3011_v47  ;;  %v3078_v47 = vld [vmem:[#allocation5 + $0x650] ss:$8 sps:$4 sm:$0xff]  }
  0x61   :  { %2358 = vmatpush1.bf16.msra.mxu0 %v3012_v48  ;;  %2154 = vmatprep.subr.bf16.mxu1 %v3013_v49  ;;  %v3083_v48 = vld [vmem:[#allocation5 + $0x164] ss:$8 sps:$4 sm:$0xff]  }
  0x62   :  { %2359 = vmatprep.subr.bf16.mxu0 %v3015_v50  ;;  %v3086_v49 = vld [vmem:[#allocation5 + $0x664] ss:$8 sps:$4 sm:$0xff]   ;;  %v3081_v50 = vld [vmem:[#allocation5 + $0x160] ss:$8 sps:$4 sm:$0xff]  }
  0x64   :  { %2155 = vmatpush1.bf16.msra.mxu1 %v3017_v53  ;;  %v3084_v53 = vld [vmem:[#allocation5 + $0x660] ss:$8 sps:$4 sm:$0xff]  }
  0x65   :  { %2360 = vmatpush1.bf16.msra.mxu0 %v3018_v55  ;;  %2156 = vmatprep.subr.bf16.mxu1 %v3019_v57  ;;  %v3092_v55 = vld [vmem:[#allocation5 + $0x674] ss:$8 sps:$4 sm:$0xff]   ;;  %v3090_v57 = vld [vmem:[#allocation5 + $0x670] ss:$8 sps:$4 sm:$0xff]  }
  0x66   :  { %2361 = vmatprep.subr.bf16.mxu0 %v3021_v58  ;;  %v3095_v58 = vld [vmem:[#allocation5 + $0x184] ss:$8 sps:$4 sm:$0xff]  }
  0x68   :  { %2157 = vmatpush1.bf16.msra.mxu1 %v3023_v63  ;;  %v3104_v63 = vld [vmem:[#allocation5 + $0x694] ss:$8 sps:$4 sm:$0xff]  }
  0x69   :  { %2362 = vmatpush1.bf16.msra.mxu0 %v3024_v0  ;;  %2158 = vmatprep.subr.bf16.mxu1 %v3025_v1  ;;  %v3099_v0 = vld [vmem:[#allocation5 + $0x190] ss:$8 sps:$4 sm:$0xff]  }
  0x6a   :  { %2363 = vmatprep.subr.bf16.mxu0 %v3027_v2  ;;  %v3102_v1 = vld [vmem:[#allocation5 + $0x690] ss:$8 sps:$4 sm:$0xff]   ;;  %v3107_v2 = vld [vmem:[#allocation5 + $0x1a4] ss:$8 sps:$4 sm:$0xff]  }
  0x6c   :  { %2159 = vmatpush1.bf16.msra.mxu1 %v3029_v5  ;;  %v3105_v5 = vld [vmem:[#allocation5 + $0x1a0] ss:$8 sps:$4 sm:$0xff]  }
  0x6d   :  { %2364 = vmatpush1.bf16.msra.mxu0 %v3030_v6  ;;  %2160 = vmatprep.subr.bf16.mxu1 %v3031_v7  ;;  %v3108_v6 = vld [vmem:[#allocation5 + $0x6a0] ss:$8 sps:$4 sm:$0xff]   ;;  %v3113_v7 = vld [vmem:[#allocation5 + $0x1b4] ss:$8 sps:$4 sm:$0xff]  }
  0x6e   :  { %2365 = vmatprep.subr.bf16.mxu0 %v3033_v8  ;;  %v3116_v8 = vld [vmem:[#allocation5 + $0x6b4] ss:$8 sps:$4 sm:$0xff]  }
  0x70   :  { %2161 = vmatpush1.bf16.msra.mxu1 %v3035_v10  ;;  %v3114_v10 = vld [vmem:[#allocation5 + $0x6b0] ss:$8 sps:$4 sm:$0xff]  }
  0x71   :  { %2366 = vmatpush1.bf16.msra.mxu0 %v3036_v11  ;;  %2162 = vmatprep.subr.bf16.mxu1 %v3037_v12  ;;  %v3119_v11 = vld [vmem:[#allocation5 + $0x1c4] ss:$8 sps:$4 sm:$0xff]  }
  0x72   :  { %2367 = vmatprep.subr.bf16.mxu0 %v3039_v13  ;;  %v3122_v12 = vld [vmem:[#allocation5 + $0x6c4] ss:$8 sps:$4 sm:$0xff]   ;;  %v3117_v13 = vld [vmem:[#allocation5 + $0x1c0] ss:$8 sps:$4 sm:$0xff]  }
  0x74   :  { %2163 = vmatpush1.bf16.msra.mxu1 %v3041_v16  ;;  %v3120_v16 = vld [vmem:[#allocation5 + $0x6c0] ss:$8 sps:$4 sm:$0xff]  }
  0x75   :  { %2368 = vmatpush1.bf16.msra.mxu0 %v3042_v17  ;;  %2173 = vmatprep.subr.bf16.mxu1 %v3046_v18  ;;  %v3125_v17 = vld [vmem:[#allocation5 + $0x1d4] ss:$8 sps:$4 sm:$0xff]  }
  0x76   :  { %2378 = vmatprep.subr.bf16.mxu0 %v3050_v19  ;;  %v3128_v18 = vld [vmem:[#allocation5 + $0x6d4] ss:$8 sps:$4 sm:$0xff]   ;;  %v3123_v19 = vld [vmem:[#allocation5 + $0x1d0] ss:$8 sps:$4 sm:$0xff]  }
  0x77   :  { %2165 = vmatmul.mubr.bf16.vlgmr.msra.gmra.mrb[0].mxu1 %v3622_v21 }
  0x78   :  { %2370 = vmatmul.mubr.bf16.vlgmr.msra.gmra.mrb[0].mxu0 %v484_v22  ;;  %2174 = vmatpush1.bf16.msra.mxu1 %v3044_v23  ;;  %v3131_v22 = vld [vmem:[#allocation5 + $0x1e4] ss:$8 sps:$4 sm:$0xff]  }
  0x79   :  { %2379 = vmatpush1.bf16.msra.mxu0 %v3048_v24  ;;  %2175 = vmatprep.subr.bf16.mxu1 %v3053_v25  ;;  %v3134_v23 = vld [vmem:[#allocation5 + $0x6e4] ss:$8 sps:$4 sm:$0xff]   ;;  %v390_v24 = vcombine.high %v3599_v52, %v3599_v52  ;;  %v3129_v25 = vld [vmem:[#allocation5 + $0x1e0] ss:$8 sps:$4 sm:$0xff]  }
  0x7a   :  { %2380 = vmatprep.subr.bf16.mxu0 %v3056_v26  ;;  %2205 = vmatprep.mubr.bf16.mxu1 %v437_v27  ;;  %v3132_v26 = vld [vmem:[#allocation5 + $0x6e0] ss:$8 sps:$4 sm:$0xff]   ;;  %v3137_v27 = vld [vmem:[#allocation5 + $0x1f4] ss:$8 sps:$4 sm:$0xff]  }
  0x7b   :  { %2410 = vmatprep.mubr.bf16.mxu0 %v3629_v28 }
  0x7c   :  { %2176 = vmatpush1.bf16.msra.mxu1 %v3051_v29  ;;  %v3140_v29 = vld [vmem:[#allocation5 + $0x6f4] ss:$8 sps:$4 sm:$0xff]  }
  0x7d   :  { %2381 = vmatpush1.bf16.msra.mxu0 %v3054_v30  ;;  %2177 = vmatprep.subr.bf16.mxu1 %v3059_v31  ;;  %v3636_v30 = vrot.slane %v390_v24, %v3597_v51  ;;  %v3135_v31 = vld [vmem:[#allocation5 + $0x1f0] ss:$8 sps:$4 sm:$0xff]  }
  0x7e   :  { %2382 = vmatprep.subr.bf16.mxu0 %v3062_v32  ;;  %v3138_v32 = vld [vmem:[#allocation5 + $0x6f0] ss:$8 sps:$4 sm:$0xff]  }
  0x7f   :  { %v406_v52 = vcombine.high %v3636_v30, %v3636_v30  ;;  %v3210_v24 = vld [vmem:[#allocation5 + $0x7b0] ss:$8 sps:$4 sm:$0xff]  }
  0x80   :  { %2178 = vmatpush1.bf16.msra.mxu1 %v3057_v33  ;;  %v3143_v33 = vld [vmem:[#allocation5 + $0x204] ss:$8 sps:$4 sm:$0xff]  }
  0x81   :  { %2383 = vmatpush1.bf16.msra.mxu0 %v3060_v34  ;;  %2179 = vmatprep.subr.bf16.mxu1 %v3065_v35  ;;  %v3146_v34 = vld [vmem:[#allocation5 + $0x704] ss:$8 sps:$4 sm:$0xff]   ;;  %v435_v35 = vcombine.high %v3622_v21, %v3622_v21  ;;  %v3150_v21 = vld [vmem:[#allocation5 + $0x710] ss:$8 sps:$4 sm:$0xff]  }
  0x82   :  { %2384 = vmatprep.subr.bf16.mxu0 %v3068_v36  ;;  %v3644_v36 = vrot.slane %v3614_v14, %v3597_v51  ;;  %v3147_v14 = vld [vmem:[#allocation5 + $0x210] ss:$8 sps:$4 sm:$0xff]  }
  0x84   :  { %2180 = vmatpush1.bf16.msra.mxu1 %v3063_v37  ;;  %v3141_v37 = vld [vmem:[#allocation5 + $0x200] ss:$8 sps:$4 sm:$0xff]  }
  0x85   :  { %2385 = vmatpush1.bf16.msra.mxu0 %v3066_v38  ;;  %2181 = vmatprep.subr.bf16.mxu1 %v3071_v39  ;;  %v3144_v38 = vld [vmem:[#allocation5 + $0x700] ss:$8 sps:$4 sm:$0xff]   ;;  %v3149_v39 = vld [vmem:[#allocation5 + $0x214] ss:$8 sps:$4 sm:$0xff]  }
  0x86   :  { %2386 = vmatprep.subr.bf16.mxu0 %v3074_v40  ;;  %v3152_v40 = vld [vmem:[#allocation5 + $0x714] ss:$8 sps:$4 sm:$0xff]  }
  0x88   :  { %2182 = vmatpush1.bf16.msra.mxu1 %v3069_v41  ;;  %v3647_v41 = vrot.slane %v406_v52, %v3597_v51  ;;  %v3227_v52 = vld [vmem:[#allocation5 + $0x2e4] ss:$8 sps:$4 sm:$0xff]  }
  0x89   :  { %2387 = vmatpush1.bf16.msra.mxu0 %v3072_v42  ;;  %2183 = vmatprep.subr.bf16.mxu1 %v3077_v43  ;;  %v487_v42 = vcombine.high %v3629_v28, %v3629_v28  ;;  %v3155_v43 = vld [vmem:[#allocation5 + $0x224] ss:$8 sps:$4 sm:$0xff]   ;;  %v3161_v28 = vld [vmem:[#allocation5 + $0x234] ss:$8 sps:$4 sm:$0xff]  }
  0x8a   :  { %2388 = vmatprep.subr.bf16.mxu0 %v3080_v44  ;;  %v3158_v44 = vld [vmem:[#allocation5 + $0x724] ss:$8 sps:$4 sm:$0xff]  }
  0x8c   :  { %2184 = vmatpush1.bf16.msra.mxu1 %v3075_v46  ;;  %v3153_v46 = vld [vmem:[#allocation5 + $0x220] ss:$8 sps:$4 sm:$0xff]  }
  0x8d   :  { %2389 = vmatpush1.bf16.msra.mxu0 %v3078_v47  ;;  %2185 = vmatprep.subr.bf16.mxu1 %v3083_v48  ;;  %v3156_v47 = vld [vmem:[#allocation5 + $0x720] ss:$8 sps:$4 sm:$0xff]   ;;  %v3164_v48 = vld [vmem:[#allocation5 + $0x734] ss:$8 sps:$4 sm:$0xff]  }
  0x8e   :  { %2390 = vmatprep.subr.bf16.mxu0 %v3086_v49  ;;  %v3159_v49 = vld [vmem:[#allocation5 + $0x230] ss:$8 sps:$4 sm:$0xff]  }
  0x90   :  { %2186 = vmatpush1.bf16.msra.mxu1 %v3081_v50  ;;  %v3162_v50 = vld [vmem:[#allocation5 + $0x730] ss:$8 sps:$4 sm:$0xff]  }
  0x91   :  { %2391 = vmatpush1.bf16.msra.mxu0 %v3084_v53  ;;  %2187 = vmatprep.subr.bf16.mxu1 %v3089_v54  ;;  %v3167_v53 = vld [vmem:[#allocation5 + $0x244] ss:$8 sps:$4 sm:$0xff]  }
  0x92   :  { %2392 = vmatprep.subr.bf16.mxu0 %v3092_v55  ;;  %v3170_v54 = vld [vmem:[#allocation5 + $0x744] ss:$8 sps:$4 sm:$0xff]   ;;  %v3165_v55 = vld [vmem:[#allocation5 + $0x240] ss:$8 sps:$4 sm:$0xff]  }
  0x94   :  { %2188 = vmatpush1.bf16.msra.mxu1 %v3087_v56  ;;  %v3168_v56 = vld [vmem:[#allocation5 + $0x740] ss:$8 sps:$4 sm:$0xff]  }
  0x95   :  { %2393 = vmatpush1.bf16.msra.mxu0 %v3090_v57  ;;  %2189 = vmatprep.subr.bf16.mxu1 %v3095_v58  ;;  %v3173_v57 = vld [vmem:[#allocation5 + $0x254] ss:$8 sps:$4 sm:$0xff]  }
  0x96   :  { %2394 = vmatprep.subr.bf16.mxu0 %v3098_v59  ;;  %v3176_v58 = vld [vmem:[#allocation5 + $0x754] ss:$8 sps:$4 sm:$0xff]   ;;  %v3171_v59 = vld [vmem:[#allocation5 + $0x250] ss:$8 sps:$4 sm:$0xff]  }
  0x98   :  { %2190 = vmatpush1.bf16.msra.mxu1 %v3093_v60  ;;  %v3174_v60 = vld [vmem:[#allocation5 + $0x750] ss:$8 sps:$4 sm:$0xff]  }
  0x99   :  { %2395 = vmatpush1.bf16.msra.mxu0 %v3096_v61  ;;  %2191 = vmatprep.subr.bf16.mxu1 %v3101_v62  ;;  %v3179_v61 = vld [vmem:[#allocation5 + $0x264] ss:$8 sps:$4 sm:$0xff]  }
  0x9a   :  { %2396 = vmatprep.subr.bf16.mxu0 %v3104_v63  ;;  %v3182_v62 = vld [vmem:[#allocation5 + $0x764] ss:$8 sps:$4 sm:$0xff]   ;;  %v3177_v63 = vld [vmem:[#allocation5 + $0x260] ss:$8 sps:$4 sm:$0xff]  }
  0x9c   :  { %2192 = vmatpush1.bf16.msra.mxu1 %v3099_v0  ;;  %v3180_v0 = vld [vmem:[#allocation5 + $0x760] ss:$8 sps:$4 sm:$0xff]  }
  0x9d   :  { %2397 = vmatpush1.bf16.msra.mxu0 %v3102_v1  ;;  %2193 = vmatprep.subr.bf16.mxu1 %v3107_v2  ;;  %v3185_v1 = vld [vmem:[#allocation5 + $0x274] ss:$8 sps:$4 sm:$0xff]  }
  0x9e   :  { %2398 = vmatprep.subr.bf16.mxu0 %v3110_v4  ;;  %v3188_v2 = vld [vmem:[#allocation5 + $0x774] ss:$8 sps:$4 sm:$0xff]   ;;  %v3183_v4 = vld [vmem:[#allocation5 + $0x270] ss:$8 sps:$4 sm:$0xff]  }
  0xa0   :  { %2194 = vmatpush1.bf16.msra.mxu1 %v3105_v5  ;;  %v3186_v5 = vld [vmem:[#allocation5 + $0x770] ss:$8 sps:$4 sm:$0xff]  }
  0xa1   :  { %2399 = vmatpush1.bf16.msra.mxu0 %v3108_v6  ;;  %2195 = vmatprep.subr.bf16.mxu1 %v3113_v7  ;;  %v3191_v6 = vld [vmem:[#allocation5 + $0x284] ss:$8 sps:$4 sm:$0xff]  }
  0xa2   :  { %2400 = vmatprep.subr.bf16.mxu0 %v3116_v8  ;;  %v3194_v7 = vld [vmem:[#allocation5 + $0x784] ss:$8 sps:$4 sm:$0xff]   ;;  %v3189_v8 = vld [vmem:[#allocation5 + $0x280] ss:$8 sps:$4 sm:$0xff]  }
  0xa4   :  { %2196 = vmatpush1.bf16.msra.mxu1 %v3111_v9  ;;  %v3192_v9 = vld [vmem:[#allocation5 + $0x780] ss:$8 sps:$4 sm:$0xff]  }
  0xa5   :  { %2401 = vmatpush1.bf16.msra.mxu0 %v3114_v10  ;;  %2197 = vmatprep.subr.bf16.mxu1 %v3119_v11  ;;  %v3197_v10 = vld [vmem:[#allocation5 + $0x294] ss:$8 sps:$4 sm:$0xff]  }
  0xa6   :  { %2402 = vmatprep.subr.bf16.mxu0 %v3122_v12  ;;  %v3200_v11 = vld [vmem:[#allocation5 + $0x794] ss:$8 sps:$4 sm:$0xff]   ;;  %v3195_v12 = vld [vmem:[#allocation5 + $0x290] ss:$8 sps:$4 sm:$0xff]  }
  0xa8   :  { %2198 = vmatpush1.bf16.msra.mxu1 %v3117_v13  ;;  %v3198_v13 = vld [vmem:[#allocation5 + $0x790] ss:$8 sps:$4 sm:$0xff]  }
  0xa9   :  { %2403 = vmatpush1.bf16.msra.mxu0 %v3120_v16  ;;  %2199 = vmatprep.subr.bf16.mxu1 %v3125_v17  ;;  %v3203_v16 = vld [vmem:[#allocation5 + $0x2a4] ss:$8 sps:$4 sm:$0xff]  }
  0xaa   :  { %2404 = vmatprep.subr.bf16.mxu0 %v3128_v18  ;;  %v3206_v17 = vld [vmem:[#allocation5 + $0x7a4] ss:$8 sps:$4 sm:$0xff]   ;;  %v3201_v18 = vld [vmem:[#allocation5 + $0x2a0] ss:$8 sps:$4 sm:$0xff]  }
  0xac   :  { %2200 = vmatpush1.bf16.msra.mxu1 %v3123_v19  ;;  %v3204_v19 = vld [vmem:[#allocation5 + $0x7a0] ss:$8 sps:$4 sm:$0xff]  }
  0xad   :  { %2405 = vmatpush1.bf16.msra.mxu0 %v3126_v20  ;;  %2201 = vmatprep.subr.bf16.mxu1 %v3131_v22  ;;  %v3209_v20 = vld [vmem:[#allocation5 + $0x2b4] ss:$8 sps:$4 sm:$0xff]  }
  0xae   :  { %2406 = vmatprep.subr.bf16.mxu0 %v3134_v23  ;;  %v3212_v22 = vld [vmem:[#allocation5 + $0x7b4] ss:$8 sps:$4 sm:$0xff]   ;;  %v3207_v23 = vld [vmem:[#allocation5 + $0x2b0] ss:$8 sps:$4 sm:$0xff]  }
  0xb0   :  { %2202 = vmatpush1.bf16.msra.mxu1 %v3129_v25  ;;  %v3215_v25 = vld [vmem:[#allocation5 + $0x2c4] ss:$8 sps:$4 sm:$0xff]  }
  0xb1   :  { %2407 = vmatpush1.bf16.msra.mxu0 %v3132_v26  ;;  %2203 = vmatprep.subr.bf16.mxu1 %v3137_v27  ;;  %v3218_v26 = vld [vmem:[#allocation5 + $0x7c4] ss:$8 sps:$4 sm:$0xff]   ;;  %v3213_v27 = vld [vmem:[#allocation5 + $0x2c0] ss:$8 sps:$4 sm:$0xff]  }
  0xb2   :  { %2408 = vmatprep.subr.bf16.mxu0 %v3140_v29  ;;  %v3216_v29 = vld [vmem:[#allocation5 + $0x7c0] ss:$8 sps:$4 sm:$0xff]  }
  0xb4   :  { %2204 = vmatpush1.bf16.msra.mxu1 %v3135_v31  ;;  %v3221_v31 = vld [vmem:[#allocation5 + $0x2d4] ss:$8 sps:$4 sm:$0xff]  }
  0xb5   :  { %2409 = vmatpush1.bf16.msra.mxu0 %v3138_v32  ;;  %2214 = vmatprep.subr.bf16.mxu1 %v3143_v33  ;;  %v3224_v32 = vld [vmem:[#allocation5 + $0x7d4] ss:$8 sps:$4 sm:$0xff]   ;;  %v3219_v33 = vld [vmem:[#allocation5 + $0x2d0] ss:$8 sps:$4 sm:$0xff]  }
  0xb6   :  { %2419 = vmatprep.subr.bf16.mxu0 %v3146_v34  ;;  %v3222_v34 = vld [vmem:[#allocation5 + $0x7d0] ss:$8 sps:$4 sm:$0xff]  }
  0xb7   :  { %2206 = vmatmul.mubr.bf16.vlgmr.msra.gmra.mrb[0].mxu1 %v435_v35  ;;  %v3230_v35 = vld [vmem:[#allocation5 + $0x7e4] ss:$8 sps:$4 sm:$0xff]  }
  0xb8   :  { %2411 = vmatmul.mubr.bf16.vlgmr.msra.gmra.mrb[0].mxu0 %v3644_v36  ;;  %2215 = vmatpush1.bf16.msra.mxu1 %v3141_v37  ;;  %v3225_v37 = vld [vmem:[#allocation5 + $0x2e0] ss:$8 sps:$4 sm:$0xff]  }
  0xb9   :  { %2420 = vmatpush1.bf16.msra.mxu0 %v3144_v38  ;;  %2216 = vmatprep.subr.bf16.mxu1 %v3149_v39  ;;  %v3228_v38 = vld [vmem:[#allocation5 + $0x7e0] ss:$8 sps:$4 sm:$0xff]   ;;  %v3233_v39 = vld [vmem:[#allocation5 + $0x2f4] ss:$8 sps:$4 sm:$0xff]  }
  0xba   :  { %2421 = vmatprep.subr.bf16.mxu0 %v3152_v40  ;;  %2246 = vmatprep.mubr.bf16.mxu1 %v3647_v41  ;;  %v3236_v40 = vld [vmem:[#allocation5 + $0x7f4] ss:$8 sps:$4 sm:$0xff]  }
  0xbb   :  { %2451 = vmatprep.mubr.bf16.mxu0 %v487_v42  ;;  %v3231_v42 = vld [vmem:[#allocation5 + $0x2f0] ss:$8 sps:$4 sm:$0xff]  }
  0xbc   :  { %2217 = vmatpush1.bf16.msra.mxu1 %v3147_v14  ;;  %v3653_v14 = vld.sshfl [vmem:[#allocation2 + $0x10] sm:$0x33 pattern:$0x75316420] }
  0xbd   :  { %2422 = vmatpush1.bf16.msra.mxu0 %v3150_v21  ;;  %2218 = vmatprep.subr.bf16.mxu1 %v3155_v43  ;;  %v3234_v21 = vld [vmem:[#allocation5 + $0x7f0] ss:$8 sps:$4 sm:$0xff]   ;;  %v3239_v43 = vld [vmem:[#allocation5 + $0x304] ss:$8 sps:$4 sm:$0xff]  }
  0xbe   :  { %2423 = vmatprep.subr.bf16.mxu0 %v3158_v44  ;;  %v3242_v44 = vld [vmem:[#allocation5 + $0x804] ss:$8 sps:$4 sm:$0xff]  }
  0xc0   :  { %2219 = vmatpush1.bf16.msra.mxu1 %v3153_v46  ;;  %v495_v46 = vcombine.high %v3653_v14, %v3653_v14 }
  0xc1   :  { %2424 = vmatpush1.bf16.msra.mxu0 %v3156_v47  ;;  %2220 = vmatprep.subr.bf16.mxu1 %v3161_v28  ;;  %v3237_v47 = vld [vmem:[#allocation5 + $0x300] ss:$8 sps:$4 sm:$0xff]   ;;  %v3659_v28 = vrot.slane %v3636_v30, %v3597_v51  ;;  %v3243_v30 = vld [vmem:[#allocation5 + $0x310] ss:$8 sps:$4 sm:$0xff]  }
  0xc2   :  { %2425 = vmatprep.subr.bf16.mxu0 %v3164_v48  ;;  %v485_v48 = vcombine.high %v3644_v36, %v3644_v36  ;;  %v3246_v36 = vld [vmem:[#allocation5 + $0x810] ss:$8 sps:$4 sm:$0xff]  }
  0xc4   :  { %2221 = vmatpush1.bf16.msra.mxu1 %v3159_v49  ;;  %v3240_v49 = vld [vmem:[#allocation5 + $0x800] ss:$8 sps:$4 sm:$0xff]  }
  0xc5   :  { %2426 = vmatpush1.bf16.msra.mxu0 %v3162_v50  ;;  %2222 = vmatprep.subr.bf16.mxu1 %v3167_v53  ;;  %v3245_v50 = vld [vmem:[#allocation5 + $0x314] ss:$8 sps:$4 sm:$0xff]  }
  0xc6   :  { %2427 = vmatprep.subr.bf16.mxu0 %v3170_v54  ;;  %v3248_v53 = vld [vmem:[#allocation5 + $0x814] ss:$8 sps:$4 sm:$0xff]   ;;  %v438_v54 = vcombine.high %v3647_v41, %v3647_v41  ;;  %v3252_v41 = vld [vmem:[#allocation5 + $0x820] ss:$8 sps:$4 sm:$0xff]  }
  0xc8   :  { %2223 = vmatpush1.bf16.msra.mxu1 %v3165_v55  ;;  %v3666_v55 = vrot.slane %v495_v46, %v3597_v51  ;;  %v3323_v46 = vld [vmem:[#allocation5 + $0x3e4] ss:$8 sps:$4 sm:$0xff]  }
  0xc9   :  { %2428 = vmatpush1.bf16.msra.mxu0 %v3168_v56  ;;  %2224 = vmatprep.subr.bf16.mxu1 %v3173_v57  ;;  %v3251_v56 = vld [vmem:[#allocation5 + $0x324] ss:$8 sps:$4 sm:$0xff]  }
  0xca   :  { %2429 = vmatprep.subr.bf16.mxu0 %v3176_v58  ;;  %v3254_v57 = vld [vmem:[#allocation5 + $0x824] ss:$8 sps:$4 sm:$0xff]   ;;  %v3249_v58 = vld [vmem:[#allocation5 + $0x320] ss:$8 sps:$4 sm:$0xff]  }
  0xcc   :  { %2225 = vmatpush1.bf16.msra.mxu1 %v3171_v59  ;;  %v3257_v59 = vld [vmem:[#allocation5 + $0x334] ss:$8 sps:$4 sm:$0xff]  }
  0xcd   :  { %2430 = vmatpush1.bf16.msra.mxu0 %v3174_v60  ;;  %2226 = vmatprep.subr.bf16.mxu1 %v3179_v61  ;;  %v3260_v60 = vld [vmem:[#allocation5 + $0x834] ss:$8 sps:$4 sm:$0xff]   ;;  %v3255_v61 = vld [vmem:[#allocation5 + $0x330] ss:$8 sps:$4 sm:$0xff]  }
  0xce   :  { %2431 = vmatprep.subr.bf16.mxu0 %v3182_v62  ;;  %v3258_v62 = vld [vmem:[#allocation5 + $0x830] ss:$8 sps:$4 sm:$0xff]  }
  0xd0   :  { %2227 = vmatpush1.bf16.msra.mxu1 %v3177_v63  ;;  %v3263_v63 = vld [vmem:[#allocation5 + $0x344] ss:$8 sps:$4 sm:$0xff]  }
  0xd1   :  { %2432 = vmatpush1.bf16.msra.mxu0 %v3180_v0  ;;  %2228 = vmatprep.subr.bf16.mxu1 %v3185_v1  ;;  %v3266_v0 = vld [vmem:[#allocation5 + $0x844] ss:$8 sps:$4 sm:$0xff]   ;;  %v3261_v1 = vld [vmem:[#allocation5 + $0x340] ss:$8 sps:$4 sm:$0xff]  }
  0xd2   :  { %2433 = vmatprep.subr.bf16.mxu0 %v3188_v2  ;;  %v3264_v2 = vld [vmem:[#allocation5 + $0x840] ss:$8 sps:$4 sm:$0xff]  }
  0xd4   :  { %2229 = vmatpush1.bf16.msra.mxu1 %v3183_v4  ;;  %v3269_v4 = vld [vmem:[#allocation5 + $0x354] ss:$8 sps:$4 sm:$0xff]  }
  0xd5   :  { %2434 = vmatpush1.bf16.msra.mxu0 %v3186_v5  ;;  %2230 = vmatprep.subr.bf16.mxu1 %v3191_v6  ;;  %v3272_v5 = vld [vmem:[#allocation5 + $0x854] ss:$8 sps:$4 sm:$0xff]   ;;  %v3267_v6 = vld [vmem:[#allocation5 + $0x350] ss:$8 sps:$4 sm:$0xff]  }
  0xd6   :  { %2435 = vmatprep.subr.bf16.mxu0 %v3194_v7  ;;  %v3270_v7 = vld [vmem:[#allocation5 + $0x850] ss:$8 sps:$4 sm:$0xff]  }
  0xd8   :  { %2231 = vmatpush1.bf16.msra.mxu1 %v3189_v8  ;;  %v3275_v8 = vld [vmem:[#allocation5 + $0x364] ss:$8 sps:$4 sm:$0xff]  }
  0xd9   :  { %2436 = vmatpush1.bf16.msra.mxu0 %v3192_v9  ;;  %2232 = vmatprep.subr.bf16.mxu1 %v3197_v10  ;;  %v3278_v9 = vld [vmem:[#allocation5 + $0x864] ss:$8 sps:$4 sm:$0xff]   ;;  %v3273_v10 = vld [vmem:[#allocation5 + $0x360] ss:$8 sps:$4 sm:$0xff]  }
  0xda   :  { %2437 = vmatprep.subr.bf16.mxu0 %v3200_v11  ;;  %v3276_v11 = vld [vmem:[#allocation5 + $0x860] ss:$8 sps:$4 sm:$0xff]  }
  0xdc   :  { %2233 = vmatpush1.bf16.msra.mxu1 %v3195_v12  ;;  %v3281_v12 = vld [vmem:[#allocation5 + $0x374] ss:$8 sps:$4 sm:$0xff]  }
  0xdd   :  { %2438 = vmatpush1.bf16.msra.mxu0 %v3198_v13  ;;  %2234 = vmatprep.subr.bf16.mxu1 %v3203_v16  ;;  %v3284_v13 = vld [vmem:[#allocation5 + $0x874] ss:$8 sps:$4 sm:$0xff]   ;;  %v3279_v16 = vld [vmem:[#allocation5 + $0x370] ss:$8 sps:$4 sm:$0xff]  }
  0xde   :  { %2439 = vmatprep.subr.bf16.mxu0 %v3206_v17  ;;  %v3282_v17 = vld [vmem:[#allocation5 + $0x870] ss:$8 sps:$4 sm:$0xff]  }
  0xe0   :  { %2235 = vmatpush1.bf16.msra.mxu1 %v3201_v18  ;;  %v3287_v18 = vld [vmem:[#allocation5 + $0x384] ss:$8 sps:$4 sm:$0xff]  }
  0xe1   :  { %2440 = vmatpush1.bf16.msra.mxu0 %v3204_v19  ;;  %2236 = vmatprep.subr.bf16.mxu1 %v3209_v20  ;;  %v3290_v19 = vld [vmem:[#allocation5 + $0x884] ss:$8 sps:$4 sm:$0xff]   ;;  %v3285_v20 = vld [vmem:[#allocation5 + $0x380] ss:$8 sps:$4 sm:$0xff]  }
  0xe2   :  { %2441 = vmatprep.subr.bf16.mxu0 %v3212_v22  ;;  %v3288_v22 = vld [vmem:[#allocation5 + $0x880] ss:$8 sps:$4 sm:$0xff]  }
  0xe4   :  { %2237 = vmatpush1.bf16.msra.mxu1 %v3207_v23  ;;  %v3293_v23 = vld [vmem:[#allocation5 + $0x394] ss:$8 sps:$4 sm:$0xff]  }
  0xe5   :  { %2442 = vmatpush1.bf16.msra.mxu0 %v3210_v24  ;;  %2238 = vmatprep.subr.bf16.mxu1 %v3215_v25  ;;  %v3296_v24 = vld [vmem:[#allocation5 + $0x894] ss:$8 sps:$4 sm:$0xff]   ;;  %v3291_v25 = vld [vmem:[#allocation5 + $0x390] ss:$8 sps:$4 sm:$0xff]  }
  0xe6   :  { %2443 = vmatprep.subr.bf16.mxu0 %v3218_v26  ;;  %v3294_v26 = vld [vmem:[#allocation5 + $0x890] ss:$8 sps:$4 sm:$0xff]  }
  0xe8   :  { %2239 = vmatpush1.bf16.msra.mxu1 %v3213_v27  ;;  %v3299_v27 = vld [vmem:[#allocation5 + $0x3a4] ss:$8 sps:$4 sm:$0xff]  }
  0xe9   :  { %2444 = vmatpush1.bf16.msra.mxu0 %v3216_v29  ;;  %2240 = vmatprep.subr.bf16.mxu1 %v3221_v31  ;;  %v3302_v29 = vld [vmem:[#allocation5 + $0x8a4] ss:$8 sps:$4 sm:$0xff]   ;;  %v3297_v31 = vld [vmem:[#allocation5 + $0x3a0] ss:$8 sps:$4 sm:$0xff]  }
  0xea   :  { %2445 = vmatprep.subr.bf16.mxu0 %v3224_v32  ;;  %v3300_v32 = vld [vmem:[#allocation5 + $0x8a0] ss:$8 sps:$4 sm:$0xff]  }
  0xec   :  { %2241 = vmatpush1.bf16.msra.mxu1 %v3219_v33  ;;  %v3305_v33 = vld [vmem:[#allocation5 + $0x3b4] ss:$8 sps:$4 sm:$0xff]  }
  0xed   :  { %2446 = vmatpush1.bf16.msra.mxu0 %v3222_v34  ;;  %2242 = vmatprep.subr.bf16.mxu1 %v3227_v52  ;;  %v3308_v34 = vld [vmem:[#allocation5 + $0x8b4] ss:$8 sps:$4 sm:$0xff]   ;;  %v3303_v52 = vld [vmem:[#allocation5 + $0x3b0] ss:$8 sps:$4 sm:$0xff]  }
  0xee   :  { %2447 = vmatprep.subr.bf16.mxu0 %v3230_v35  ;;  %v3306_v35 = vld [vmem:[#allocation5 + $0x8b0] ss:$8 sps:$4 sm:$0xff]  }
  0xf0   :  { %2243 = vmatpush1.bf16.msra.mxu1 %v3225_v37  ;;  %v3311_v37 = vld [vmem:[#allocation5 + $0x3c4] ss:$8 sps:$4 sm:$0xff]  }
  0xf1   :  { %2448 = vmatpush1.bf16.msra.mxu0 %v3228_v38  ;;  %2244 = vmatprep.subr.bf16.mxu1 %v3233_v39  ;;  %v3314_v38 = vld [vmem:[#allocation5 + $0x8c4] ss:$8 sps:$4 sm:$0xff]   ;;  %v3309_v39 = vld [vmem:[#allocation5 + $0x3c0] ss:$8 sps:$4 sm:$0xff]  }
  0xf2   :  { %2449 = vmatprep.subr.bf16.mxu0 %v3236_v40  ;;  %v3312_v40 = vld [vmem:[#allocation5 + $0x8c0] ss:$8 sps:$4 sm:$0xff]  }
  0xf4   :  { %2245 = vmatpush1.bf16.msra.mxu1 %v3231_v42  ;;  %v3317_v42 = vld [vmem:[#allocation5 + $0x3d4] ss:$8 sps:$4 sm:$0xff]  }
  0xf5   :  { %2450 = vmatpush1.bf16.msra.mxu0 %v3234_v21  ;;  %2255 = vmatprep.subr.bf16.mxu1 %v3239_v43  ;;  %v3320_v21 = vld [vmem:[#allocation5 + $0x8d4] ss:$8 sps:$4 sm:$0xff]   ;;  %v3315_v43 = vld [vmem:[#allocation5 + $0x3d0] ss:$8 sps:$4 sm:$0xff]  }
  0xf6   :  { %2460 = vmatprep.subr.bf16.mxu0 %v3242_v44  ;;  %v3318_v44 = vld [vmem:[#allocation5 + $0x8d0] ss:$8 sps:$4 sm:$0xff]  }
  0xf7   :  { %2247 = vmatmul.mubr.bf16.vlgmr.msra.gmra.mrb[0].mxu1 %v3659_v28 }
  0xf8   :  { %2452 = vmatmul.mubr.bf16.vlgmr.msra.gmra.mrb[0].mxu0 %v485_v48  ;;  %2256 = vmatpush1.bf16.msra.mxu1 %v3237_v47  ;;  %v3326_v47 = vld [vmem:[#allocation5 + $0x8e4] ss:$8 sps:$4 sm:$0xff]   ;;  %v3321_v48 = vld [vmem:[#allocation5 + $0x3e0] ss:$8 sps:$4 sm:$0xff]  }
  0xf9   :  { %2461 = vmatpush1.bf16.msra.mxu0 %v3240_v49  ;;  %2257 = vmatprep.subr.bf16.mxu1 %v3245_v50  ;;  %v3324_v49 = vld [vmem:[#allocation5 + $0x8e0] ss:$8 sps:$4 sm:$0xff]   ;;  %v3329_v50 = vld [vmem:[#allocation5 + $0x3f4] ss:$8 sps:$4 sm:$0xff]  }
  0xfa   :  { %2462 = vmatprep.subr.bf16.mxu0 %v3248_v53  ;;  %2287 = vmatprep.mubr.bf16.mxu1 %v438_v54  ;;  %v3332_v53 = vld [vmem:[#allocation5 + $0x8f4] ss:$8 sps:$4 sm:$0xff]   ;;  %v3327_v54 = vld [vmem:[#allocation5 + $0x3f0] ss:$8 sps:$4 sm:$0xff]  }
  0xfb   :  { %2492 = vmatprep.mubr.bf16.mxu0 %v3666_v55 }
  0xfc   :  { %2258 = vmatpush1.bf16.msra.mxu1 %v3243_v30  ;;  %v3330_v30 = vld [vmem:[#allocation5 + $0x8f0] ss:$8 sps:$4 sm:$0xff]  }
  0xfd   :  { %2463 = vmatpush1.bf16.msra.mxu0 %v3246_v36  ;;  %2259 = vmatprep.subr.bf16.mxu1 %v3251_v56  ;;  %v3335_v36 = vld [vmem:[#allocation5 + $0x404] ss:$8 sps:$4 sm:$0xff]  }
  0xfe   :  { %2464 = vmatprep.subr.bf16.mxu0 %v3254_v57  ;;  %v3338_v56 = vld [vmem:[#allocation5 + $0x904] ss:$8 sps:$4 sm:$0xff]   ;;  %v436_v57 = vcombine.high %v3659_v28, %v3659_v28  ;;  %v3339_v28 = vld [vmem:[#allocation5 + $0x410] ss:$8 sps:$4 sm:$0xff]  }
 0x100   :  { %2260 = vmatpush1.bf16.msra.mxu1 %v3249_v58  ;;  %v3674_v58 = vrot.slane %v3653_v14, %v3597_v51  ;;  %v3347_v51 = vld [vmem:[#allocation5 + $0x424] ss:$8 sps:$4 sm:$0xff]  }
 0x101   :  { %2465 = vmatpush1.bf16.msra.mxu0 %v3252_v41  ;;  %2261 = vmatprep.subr.bf16.mxu1 %v3257_v59  ;;  %v3333_v41 = vld [vmem:[#allocation5 + $0x400] ss:$8 sps:$4 sm:$0xff]   ;;  %v3350_v14 = vld [vmem:[#allocation5 + $0x924] ss:$8 sps:$4 sm:$0xff]  }
 0x102   :  { %2466 = vmatprep.subr.bf16.mxu0 %v3260_v60  ;;  %v3336_v59 = vld [vmem:[#allocation5 + $0x900] ss:$8 sps:$4 sm:$0xff]   ;;  %v3341_v60 = vld [vmem:[#allocation5 + $0x414] ss:$8 sps:$4 sm:$0xff]  }
 0x104   :  { %2262 = vmatpush1.bf16.msra.mxu1 %v3255_v61  ;;  %v3344_v61 = vld [vmem:[#allocation5 + $0x914] ss:$8 sps:$4 sm:$0xff]  }
 0x105   :  { %2467 = vmatpush1.bf16.msra.mxu0 %v3258_v62  ;;  %2263 = vmatprep.subr.bf16.mxu1 %v3263_v63  ;;  %v511_v62 = vcombine.high %v3666_v55, %v3666_v55  ;;  %v3342_v63 = vld [vmem:[#allocation5 + $0x910] ss:$8 sps:$4 sm:$0xff]   ;;  %v3353_v55 = vld [vmem:[#allocation5 + $0x434] ss:$8 sps:$4 sm:$0xff]  }
 0x106   :  { %2468 = vmatprep.subr.bf16.mxu0 %v3266_v0  ;;  %v3345_v0 = vld [vmem:[#allocation5 + $0x420] ss:$8 sps:$4 sm:$0xff]  }
 0x108   :  { %2264 = vmatpush1.bf16.msra.mxu1 %v3261_v1  ;;  %v3348_v1 = vld [vmem:[#allocation5 + $0x920] ss:$8 sps:$4 sm:$0xff]  }
 0x109   :  { %2469 = vmatpush1.bf16.msra.mxu0 %v3264_v2  ;;  %2265 = vmatprep.subr.bf16.mxu1 %v3269_v4  ;;  %v3356_v2 = vld [vmem:[#allocation5 + $0x934] ss:$8 sps:$4 sm:$0xff]   ;;  %v3351_v4 = vld [vmem:[#allocation5 + $0x430] ss:$8 sps:$4 sm:$0xff]  }
 0x10a   :  { %2470 = vmatprep.subr.bf16.mxu0 %v3272_v5  ;;  %v3354_v5 = vld [vmem:[#allocation5 + $0x930] ss:$8 sps:$4 sm:$0xff]  }
 0x10c   :  { %2266 = vmatpush1.bf16.msra.mxu1 %v3267_v6  ;;  %v3359_v6 = vld [vmem:[#allocation5 + $0x444] ss:$8 sps:$4 sm:$0xff]  }
 0x10d   :  { %2471 = vmatpush1.bf16.msra.mxu0 %v3270_v7  ;;  %2267 = vmatprep.subr.bf16.mxu1 %v3275_v8  ;;  %v3362_v7 = vld [vmem:[#allocation5 + $0x944] ss:$8 sps:$4 sm:$0xff]   ;;  %v3360_v8 = vld [vmem:[#allocation5 + $0x940] ss:$8 sps:$4 sm:$0xff]  }
 0x10e   :  { %2472 = vmatprep.subr.bf16.mxu0 %v3278_v9  ;;  %v3365_v9 = vld [vmem:[#allocation5 + $0x454] ss:$8 sps:$4 sm:$0xff]  }
 0x110   :  { %2268 = vmatpush1.bf16.msra.mxu1 %v3273_v10  ;;  %v3368_v10 = vld [vmem:[#allocation5 + $0x954] ss:$8 sps:$4 sm:$0xff]  }
 0x111   :  { %2473 = vmatpush1.bf16.msra.mxu0 %v3276_v11  ;;  %2269 = vmatprep.subr.bf16.mxu1 %v3281_v12  ;;  %v3363_v11 = vld [vmem:[#allocation5 + $0x450] ss:$8 sps:$4 sm:$0xff]  }
 0x112   :  { %2474 = vmatprep.subr.bf16.mxu0 %v3284_v13  ;;  %v3366_v12 = vld [vmem:[#allocation5 + $0x950] ss:$8 sps:$4 sm:$0xff]   ;;  %v3371_v13 = vld [vmem:[#allocation5 + $0x464] ss:$8 sps:$4 sm:$0xff]  }
 0x114   :  { %2270 = vmatpush1.bf16.msra.mxu1 %v3279_v16  ;;  %v3374_v16 = vld [vmem:[#allocation5 + $0x964] ss:$8 sps:$4 sm:$0xff]  }
 0x115   :  { %2475 = vmatpush1.bf16.msra.mxu0 %v3282_v17  ;;  %2271 = vmatprep.subr.bf16.mxu1 %v3287_v18  ;;  %v3369_v17 = vld [vmem:[#allocation5 + $0x460] ss:$8 sps:$4 sm:$0xff]  }
 0x116   :  { %2476 = vmatprep.subr.bf16.mxu0 %v3290_v19  ;;  %v3372_v18 = vld [vmem:[#allocation5 + $0x960] ss:$8 sps:$4 sm:$0xff]   ;;  %v3377_v19 = vld [vmem:[#allocation5 + $0x474] ss:$8 sps:$4 sm:$0xff]  }
 0x118   :  { %2272 = vmatpush1.bf16.msra.mxu1 %v3285_v20  ;;  %v3380_v20 = vld [vmem:[#allocation5 + $0x974] ss:$8 sps:$4 sm:$0xff]  }
 0x119   :  { %2477 = vmatpush1.bf16.msra.mxu0 %v3288_v22  ;;  %2273 = vmatprep.subr.bf16.mxu1 %v3293_v23  ;;  %v3375_v22 = vld [vmem:[#allocation5 + $0x470] ss:$8 sps:$4 sm:$0xff]  }
 0x11a   :  { %2478 = vmatprep.subr.bf16.mxu0 %v3296_v24  ;;  %v3378_v23 = vld [vmem:[#allocation5 + $0x970] ss:$8 sps:$4 sm:$0xff]   ;;  %v3383_v24 = vld [vmem:[#allocation5 + $0x484] ss:$8 sps:$4 sm:$0xff]  }
 0x11c   :  { %2274 = vmatpush1.bf16.msra.mxu1 %v3291_v25  ;;  %v3386_v25 = vld [vmem:[#allocation5 + $0x984] ss:$8 sps:$4 sm:$0xff]  }
 0x11d   :  { %2479 = vmatpush1.bf16.msra.mxu0 %v3294_v26  ;;  %2275 = vmatprep.subr.bf16.mxu1 %v3299_v27  ;;  %v3381_v26 = vld [vmem:[#allocation5 + $0x480] ss:$8 sps:$4 sm:$0xff]  }
 0x11e   :  { %2480 = vmatprep.subr.bf16.mxu0 %v3302_v29  ;;  %v3384_v27 = vld [vmem:[#allocation5 + $0x980] ss:$8 sps:$4 sm:$0xff]   ;;  %v3389_v29 = vld [vmem:[#allocation5 + $0x494] ss:$8 sps:$4 sm:$0xff]  }
 0x120   :  { %2276 = vmatpush1.bf16.msra.mxu1 %v3297_v31  ;;  %v3392_v31 = vld [vmem:[#allocation5 + $0x994] ss:$8 sps:$4 sm:$0xff]  }
 0x121   :  { %2481 = vmatpush1.bf16.msra.mxu0 %v3300_v32  ;;  %2277 = vmatprep.subr.bf16.mxu1 %v3305_v33  ;;  %v3387_v32 = vld [vmem:[#allocation5 + $0x490] ss:$8 sps:$4 sm:$0xff]  }
 0x122   :  { %2482 = vmatprep.subr.bf16.mxu0 %v3308_v34  ;;  %v3390_v33 = vld [vmem:[#allocation5 + $0x990] ss:$8 sps:$4 sm:$0xff]   ;;  %v3395_v34 = vld [vmem:[#allocation5 + $0x4a4] ss:$8 sps:$4 sm:$0xff]  }
 0x124   :  { %2278 = vmatpush1.bf16.msra.mxu1 %v3303_v52  ;;  %v3398_v52 = vld [vmem:[#allocation5 + $0x9a4] ss:$8 sps:$4 sm:$0xff]  }
 0x125   :  { %2483 = vmatpush1.bf16.msra.mxu0 %v3306_v35  ;;  %2279 = vmatprep.subr.bf16.mxu1 %v3311_v37  ;;  %v3393_v35 = vld [vmem:[#allocation5 + $0x4a0] ss:$8 sps:$4 sm:$0xff]  }
 0x126   :  { %2484 = vmatprep.subr.bf16.mxu0 %v3314_v38  ;;  %v3396_v37 = vld [vmem:[#allocation5 + $0x9a0] ss:$8 sps:$4 sm:$0xff]   ;;  %v3401_v38 = vld [vmem:[#allocation5 + $0x4b4] ss:$8 sps:$4 sm:$0xff]  }
 0x128   :  { %2280 = vmatpush1.bf16.msra.mxu1 %v3309_v39  ;;  %v3404_v39 = vld [vmem:[#allocation5 + $0x9b4] ss:$8 sps:$4 sm:$0xff]  }
 0x129   :  { %2485 = vmatpush1.bf16.msra.mxu0 %v3312_v40  ;;  %2281 = vmatprep.subr.bf16.mxu1 %v3317_v42  ;;  %v3399_v40 = vld [vmem:[#allocation5 + $0x4b0] ss:$8 sps:$4 sm:$0xff]  }
 0x12a   :  { %2486 = vmatprep.subr.bf16.mxu0 %v3320_v21  ;;  %v3402_v42 = vld [vmem:[#allocation5 + $0x9b0] ss:$8 sps:$4 sm:$0xff]   ;;  %v3407_v21 = vld [vmem:[#allocation5 + $0x4c4] ss:$8 sps:$4 sm:$0xff]  }
 0x12c   :  { %2282 = vmatpush1.bf16.msra.mxu1 %v3315_v43  ;;  %v3410_v43 = vld [vmem:[#allocation5 + $0x9c4] ss:$8 sps:$4 sm:$0xff]  }
 0x12d   :  { %2487 = vmatpush1.bf16.msra.mxu0 %v3318_v44  ;;  %2283 = vmatprep.subr.bf16.mxu1 %v3323_v46  ;;  %v3405_v44 = vld [vmem:[#allocation5 + $0x4c0] ss:$8 sps:$4 sm:$0xff]  }
 0x12e   :  { %2488 = vmatprep.subr.bf16.mxu0 %v3326_v47  ;;  %v3408_v46 = vld [vmem:[#allocation5 + $0x9c0] ss:$8 sps:$4 sm:$0xff]   ;;  %v3413_v47 = vld [vmem:[#allocation5 + $0x4d4] ss:$8 sps:$4 sm:$0xff]  }
 0x130   :  { %2284 = vmatpush1.bf16.msra.mxu1 %v3321_v48  ;;  %v3416_v48 = vld [vmem:[#allocation5 + $0x9d4] ss:$8 sps:$4 sm:$0xff]  }
 0x131   :  { %2489 = vmatpush1.bf16.msra.mxu0 %v3324_v49  ;;  %2285 = vmatprep.subr.bf16.mxu1 %v3329_v50  ;;  %v3411_v49 = vld [vmem:[#allocation5 + $0x4d0] ss:$8 sps:$4 sm:$0xff]  }
 0x132   :  { %2490 = vmatprep.subr.bf16.mxu0 %v3332_v53  ;;  %v3414_v50 = vld [vmem:[#allocation5 + $0x9d0] ss:$8 sps:$4 sm:$0xff]   ;;  %v3419_v53 = vld [vmem:[#allocation5 + $0x4e4] ss:$8 sps:$4 sm:$0xff]  }
 0x134   :  { %2286 = vmatpush1.bf16.msra.mxu1 %v3327_v54  ;;  %v3422_v54 = vld [vmem:[#allocation5 + $0x9e4] ss:$8 sps:$4 sm:$0xff]  }
 0x135   :  { %2491 = vmatpush1.bf16.msra.mxu0 %v3330_v30  ;;  %2296 = vmatprep.subr.bf16.mxu1 %v3335_v36  ;;  %v3417_v30 = vld [vmem:[#allocation5 + $0x4e0] ss:$8 sps:$4 sm:$0xff]  }
 0x136   :  { %2501 = vmatprep.subr.bf16.mxu0 %v3338_v56  ;;  %v3420_v36 = vld [vmem:[#allocation5 + $0x9e0] ss:$8 sps:$4 sm:$0xff]   ;;  %v3425_v56 = vld [vmem:[#allocation5 + $0x4f4] ss:$8 sps:$4 sm:$0xff]  }
 0x137   :  { %2288 = vmatmul.mubr.bf16.vlgmr.msra.gmra.mrb[0].mxu1 %v436_v57  ;;  %v3428_v57 = vld [vmem:[#allocation5 + $0x9f4] ss:$8 sps:$4 sm:$0xff]  }
 0x138   :  { %2493 = vmatmul.mubr.bf16.vlgmr.msra.gmra.mrb[0].mxu0 %v3674_v58  ;;  %2297 = vmatpush1.bf16.msra.mxu1 %v3333_v41  ;;  %v3423_v41 = vld [vmem:[#allocation5 + $0x4f0] ss:$8 sps:$4 sm:$0xff]  }
 0x139   :  { %2502 = vmatpush1.bf16.msra.mxu0 %v3336_v59  ;;  %2298 = vmatprep.subr.bf16.mxu1 %v3341_v60  ;;  %v3426_v59 = vld [vmem:[#allocation5 + $0x9f0] ss:$8 sps:$4 sm:$0xff]   ;;  %v510_v60 = vcombine.high %v3674_v58, %v3674_v58 }
 0x13a   :  { %2503 = vmatprep.subr.bf16.mxu0 %v3344_v61  ;;  %2328 = vmatprep.mubr.bf16.mxu1 %v3608_v3  ;;  %v3357_v3 = vld [vmem:[#allocation5 + $0x440] ss:$8 sps:$4 sm:$0xff]   ;;  %v379_v61 = vsub.s32 0, %v3594_v45 }
 0x13b   :  { %2533 = vmatprep.mubr.bf16.mxu0 %v511_v62  ;;  %v375_v62 = vld [vmem:[#allocation7] sm:$0x3] }
 0x13c   :  { %2299 = vmatpush1.bf16.msra.mxu1 %v3339_v28  ;;  %v383_v28 = vsub.s32 1, %v3594_v45 }
 0x13d   :  { %2504 = vmatpush1.bf16.msra.mxu0 %v3342_v63  ;;  %2300 = vmatprep.subr.bf16.mxu1 %v3347_v51  ;;  %v380_v63 = vrot.slane %v375_v62, %v379_v61 }
 0x13e   :  { %2505 = vmatprep.subr.bf16.mxu0 %v3350_v14  ;;  %v384_v51 = vrot.slane %v375_v62, %v383_v28 }
 0x140   :  { %2301 = vmatpush1.bf16.msra.mxu1 %v3345_v0 }
 0x141   :  { %2506 = vmatpush1.bf16.msra.mxu0 %v3348_v1  ;;  %2302 = vmatprep.subr.bf16.mxu1 %v3353_v55 }
 0x142   :  { %2507 = vmatprep.subr.bf16.mxu0 %v3356_v2 }
 0x144   :  { %2303 = vmatpush1.bf16.msra.mxu1 %v3351_v4 }
 0x145   :  { %2508 = vmatpush1.bf16.msra.mxu0 %v3354_v5  ;;  %2304 = vmatprep.subr.bf16.mxu1 %v3359_v6 }
 0x146   :  { %2509 = vmatprep.subr.bf16.mxu0 %v3362_v7 }
 0x148   :  { %2305 = vmatpush1.bf16.msra.mxu1 %v3357_v3 }
 0x149   :  { %2510 = vmatpush1.bf16.msra.mxu0 %v3360_v8  ;;  %2306 = vmatprep.subr.bf16.mxu1 %v3365_v9 }
 0x14a   :  { %2511 = vmatprep.subr.bf16.mxu0 %v3368_v10 }
 0x14c   :  { %2307 = vmatpush1.bf16.msra.mxu1 %v3363_v11 }
 0x14d   :  { %2512 = vmatpush1.bf16.msra.mxu0 %v3366_v12  ;;  %2308 = vmatprep.subr.bf16.mxu1 %v3371_v13 }
 0x14e   :  { %2513 = vmatprep.subr.bf16.mxu0 %v3374_v16 }
 0x150   :  { %2309 = vmatpush1.bf16.msra.mxu1 %v3369_v17 }
 0x151   :  { %2514 = vmatpush1.bf16.msra.mxu0 %v3372_v18  ;;  %2310 = vmatprep.subr.bf16.mxu1 %v3377_v19 }
 0x152   :  { %2515 = vmatprep.subr.bf16.mxu0 %v3380_v20 }
 0x154   :  { %2311 = vmatpush1.bf16.msra.mxu1 %v3375_v22 }
 0x155   :  { %2516 = vmatpush1.bf16.msra.mxu0 %v3378_v23  ;;  %2312 = vmatprep.subr.bf16.mxu1 %v3383_v24 }
 0x156   :  { %2517 = vmatprep.subr.bf16.mxu0 %v3386_v25 }
 0x158   :  { %2313 = vmatpush1.bf16.msra.mxu1 %v3381_v26 }
 0x159   :  { %2518 = vmatpush1.bf16.msra.mxu0 %v3384_v27  ;;  %2314 = vmatprep.subr.bf16.mxu1 %v3389_v29 }
 0x15a   :  { %2519 = vmatprep.subr.bf16.mxu0 %v3392_v31 }
 0x15c   :  { %2315 = vmatpush1.bf16.msra.mxu1 %v3387_v32 }
 0x15d   :  { %2520 = vmatpush1.bf16.msra.mxu0 %v3390_v33  ;;  %2316 = vmatprep.subr.bf16.mxu1 %v3395_v34 }
 0x15e   :  { %2521 = vmatprep.subr.bf16.mxu0 %v3398_v52 }
 0x160   :  { %2317 = vmatpush1.bf16.msra.mxu1 %v3393_v35 }
 0x161   :  { %2522 = vmatpush1.bf16.msra.mxu0 %v3396_v37  ;;  %2318 = vmatprep.subr.bf16.mxu1 %v3401_v38 }
 0x162   :  { %2523 = vmatprep.subr.bf16.mxu0 %v3404_v39 }
 0x164   :  { %2319 = vmatpush1.bf16.msra.mxu1 %v3399_v40 }
 0x165   :  { %2524 = vmatpush1.bf16.msra.mxu0 %v3402_v42  ;;  %2320 = vmatprep.subr.bf16.mxu1 %v3407_v21 }
 0x166   :  { %2525 = vmatprep.subr.bf16.mxu0 %v3410_v43 }
 0x168   :  { %2321 = vmatpush1.bf16.msra.mxu1 %v3405_v44 }
 0x169   :  { %2526 = vmatpush1.bf16.msra.mxu0 %v3408_v46  ;;  %2322 = vmatprep.subr.bf16.mxu1 %v3413_v47 }
 0x16a   :  { %2527 = vmatprep.subr.bf16.mxu0 %v3416_v48 }
 0x16c   :  { %2323 = vmatpush1.bf16.msra.mxu1 %v3411_v49 }
 0x16d   :  { %2528 = vmatpush1.bf16.msra.mxu0 %v3414_v50  ;;  %2324 = vmatprep.subr.bf16.mxu1 %v3419_v53 }
 0x16e   :  { %2529 = vmatprep.subr.bf16.mxu0 %v3422_v54 }
 0x170   :  { %2325 = vmatpush1.bf16.msra.mxu1 %v3417_v30 }
 0x171   :  { %2530 = vmatpush1.bf16.msra.mxu0 %v3420_v36  ;;  %2326 = vmatprep.subr.bf16.mxu1 %v3425_v56 }
 0x172   :  { %2531 = vmatprep.subr.bf16.mxu0 %v3428_v57 }
 0x174   :  { %2327 = vmatpush1.bf16.msra.mxu1 %v3423_v41 }
 0x175   :  { %2532 = vmatpush1.bf16.msra.mxu0 %v3426_v59 }
 0x177   :  { %2329 = vmatmul.mubr.bf16.vlgmr.msra.gmra.mrb[0].mxu1 %v3617_v15 }
 0x178   :  { %2534 = vmatmul.mubr.bf16.vlgmr.msra.gmra.mrb[0].mxu0 %v510_v60 }
 0x24a   :  { %v2330_v14 = vpop.f32.mrb[0].mxu1 }
 0x24b   :  { %v2535_v0 = vpop.f32.mrb[0].mxu0  ;;  %v2904_v1 = vadd.f32 %v2330_v14, %v380_v63  ;;  %v2332_v55 = vpop.f32.mrb[1].mxu1 }
 0x24c   :  { %v2537_v2 = vpop.f32.mrb[1].mxu0  ;;  %v2906_v4 = vadd.f32 %v2332_v55, %v384_v51  ;;  %v2334_v5 = vpop.f32.mrb[2].mxu1 }
 0x24d   :  { %v2539_v58 = vpop.f32.mrb[2].mxu0  ;;  %v2905_v6 = vadd.f32 %v2904_v1, %v2535_v0  ;;  %v2335_v7 = vpop.f32.mrb[3].mxu1 }
 0x24e   :  { %v2540_v15 = vpop.f32.mrb[3].mxu0  ;;  %v2907_v3 = vadd.f32 %v2906_v4, %v2537_v2 }
 0x24f   :  { %v2543_v8 = vsel %vm2542_vm0, %v2905_v6, -inf }
 0x250   :  { %2544 = vmax.xlane.f32.xlu0 %v2543_v8  ;;  %v2555_v45 = vsel %vm2542_vm0, %v2907_v3, -inf }
 0x254   :  { %2556 = vmax.xlane.f32.xlu0 %v2555_v45 }
 0x2dd   :  { %v2545_v9 = vpop.xlane.xlu0 %2544 }
 0x2de   :  { %v2546_v10 = vsub.f32 %v2905_v6, %v2545_v9 }
 0x2e0   :  { %v2547_v11 = vmul.f32 1.442695, %v2546_v10 }
 0x2e1   :  { %v2557_v12 = vpop.xlane.xlu0 %2556 }
 0x2e2   :  { %3429 = vpow2.f32 %v2547_v11  ;;  %v2558_v13 = vsub.f32 %v2907_v3, %v2557_v12 }
 0x2e4   :  { %v2559_v16 = vmul.f32 1.442695, %v2558_v13 }
 0x2e6   :  { %3431 = vpow2.f32 %v2559_v16 }
 0x2ec   :  { %v3430_v17 = vpop.eup %3429 }
 0x2ed   :  { %v2549_v18 = vsel %vm2542_vm0, %v3430_v17, 0.0 }
 0x2ee   :  { %2550 = vadd.xlane.f32.xlu1 %v2549_v18 }
 0x2f0   :  { %v3432_v19 = vpop.eup %3431 }
 0x2f1   :  { %v2561_v20 = vsel %vm2542_vm0, %v3432_v19, 0.0 }
 0x2f2   :  { %2562 = vadd.xlane.f32.xlu1 %v2561_v20 }
 0x37b   :  { %v2551_v22 = vpop.xlane.xlu1 %2550 }
 0x37c   :  { %3433 = vrcp.f32 %v2551_v22 }
 0x37f   :  { %v2563_v23 = vpop.xlane.xlu1 %2562 }
 0x380   :  { %3435 = vrcp.f32 %v2563_v23 }
 0x386   :  { %v3434_v24 = vpop.eup %3433 }
 0x387   :  { %v2553_v25 = vmul.f32 %v3434_v24, %v3430_v17 }
 0x389   :  { %2554 = vst [vmem:[#allocation8] sm:$0x3] %v2553_v25 }
 0x38a   :  { %v3436_v26 = vpop.eup %3435 }
 0x38b   :  { %v2565_v27 = vmul.f32 %v3436_v26, %v3432_v19 }
 0x38d   :  { %2566 = vst [vmem:[#allocation8 + $0x2] sm:$0x3] %v2565_v27 }
 0x38e   :  { %3514 = shalt.err (!%p3511_p0)
}
 0x38f   :  { %s3515_s25 = scalar_lea.hbm %s3704_s3, 64 }
 0x390   :  { %p3516_p1 = scmp.ne.s32.totalorder %s3704_s3, %s3515_s25  ;;  %p3519_p2 = scmp.lt.u32.totalorder %s3515_s25, %s3704_s3 }
 0x392   :  { %p3521_p3 = pnand %p3519_p2, %p3516_p1 }
 0x394   :  { %3524 = shalt.err (!%p3521_p3)
}
 0x395   :  { %2576 = dma.vmem_to_hbm [thread:$0]  %s2574_s21, 64, %s3704_s3, [#allocation4]  }
 0x396   :  { %3529 = dma.done.wait [#allocation4], 64  }
 0x397   :  { %3530 = vsyncadd [#allocation4], 4294967232 }
 0x398   :  { %2580 = vsyncpa [#allocation3], 1 }
 0x399   :  { %2581 = vsyncpa [#allocation6], 1 }
 0x39a   :  { %2582 = vsyncpa [#allocation4], 1 }

</bundles_post_ra>
